<compile_context>
chip_gen: v7x
topology: tpu7x:2x2x1
jax: 0.10.0
libtpu: 0.0.40
codegen_flags: <defaults>
</compile_context>

<pallas_src>
import math

import jax
import jax.numpy as jnp
from jax import lax
from jax.experimental import pallas as pl
from jax.experimental.pallas import tpu as pltpu

HIDDEN = 32
DEPTH = 3
NUM_HEADS = 2              # GlobalGraph(hidden_size, num_attention_heads=2)
EPS = 1e-5                 # LayerNorm variance epsilon
MATMUL_DTYPE = jnp.bfloat16  # MXU operand dtype (f32 accumulation everywhere)


def _cdiv(a, b):
    return -(-a // b)


def _layernorm(x, gamma, beta):
    # Matches lib.LayerNorm: biased variance over last dim, eps inside sqrt.
    u = jnp.mean(x, axis=-1, keepdims=True)
    s = jnp.mean((x - u) ** 2, axis=-1, keepdims=True)
    xn = (x - u) / jnp.sqrt(s + EPS)
    return gamma[None, :] * xn + beta[None, :]


def _make_kernel(bb, n, h):
    """Kernel processing a block of `bb` sequences of padded length `n`."""
    bbn = bb * n
    hd = h // NUM_HEADS
    scale = 1.0 / math.sqrt(hd)

    def kernel(lens_ref,                      # scalar-prefetch: [B_pad] int32 in SMEM
               x_ref,                         # [bb, n, h] bf16
               mlp_w_ref, mlp_b_ref, mlp_g_ref, mlp_be_ref,
               qkv_w_ref, qkv_b_ref,
               ln_g_ref, ln_b_ref,
               out_ref):                      # [bb, n, h] f32
        b0 = pl.program_id(0) * bb

        # Flatten the sequence block: all dense matmuls run on [bb*n, h].
        x = x_ref[...].reshape(bbn, h)        # bf16 (leading-dim merge, free)

        mlp_w = mlp_w_ref[...]                # [2, H, H]  bf16
        mlp_b = mlp_b_ref[...]                # [2, H]     f32
        mlp_g = mlp_g_ref[...]                # [2, H]     f32
        mlp_be = mlp_be_ref[...]              # [2, H]     f32
        qkv_w = qkv_w_ref[...]                # [DEPTH, H, 3H] bf16 (fused Q|K|V)
        qkv_b = qkv_b_ref[...]                # [DEPTH, 3H]    f32
        ln_g = ln_g_ref[...]                  # [DEPTH, H]     f32
        ln_b = ln_b_ref[...]                  # [DEPTH, H]     f32

        # layer_0 and layer_0_again: Linear -> LayerNorm -> ReLU  (f32 math)
        xa = x
        for m in range(2):
            hlin = jnp.dot(xa.astype(MATMUL_DTYPE), mlp_w[m],
                           preferred_element_type=jnp.float32) + mlp_b[m][None, :]
            hlin = _layernorm(hlin, mlp_g[m], mlp_be[m])
            xa = jnp.maximum(hlin, 0.0)       # f32 from here on

        # ---- additive attention bias, built in-kernel from lengths (SMEM) ----
        # Within a sequence: 0 where both query and key positions are valid,
        # -10000 otherwise (exactly the reference (1-mask)*-10000).
        # Across sequences (block-diagonal packing artifact): -1e9, so padded
        # query rows still softmax over only their own sequence's N keys.
        row_iota = lax.broadcasted_iota(jnp.int32, (n, 1), 0)
        col_iota = lax.broadcasted_iota(jnp.int32, (1, n), 1)
        vr_parts, vc_parts = [], []
        for s in range(bb):
            length_s = lens_ref[b0 + s]       # scalar SMEM read
            vr_parts.append((row_iota < length_s).astype(jnp.float32))
            vc_parts.append((col_iota < length_s).astype(jnp.float32))
        valid_r = jnp.concatenate(vr_parts, axis=0)        # [bbn, 1]
        valid_c = jnp.concatenate(vc_parts, axis=1)        # [1, bbn]
        inside = valid_r * valid_c                         # [bbn, bbn]

        # block-diagonal "same sequence" indicator (trace-time constant)
        seq_r = jnp.concatenate(
            [jnp.full((n, 1), s, jnp.int32) for s in range(bb)], axis=0)
        seq_c = jnp.concatenate(
            [jnp.full((1, n), s, jnp.int32) for s in range(bb)], axis=1)
        same = (seq_r == seq_c).astype(jnp.float32)        # [bbn, bbn]

        bias = same * (1.0 - inside) * (-10000.0) + (1.0 - same) * (-1e9)

        # head lane masks (0/1), hoisted out of the depth loop
        lane = lax.broadcasted_iota(jnp.int32, (1, h), 1)
        head_masks = [
            ((lane >= i * hd) & (lane < (i + 1) * hd)).astype(MATMUL_DTYPE)
            for i in range(NUM_HEADS)
        ]

        # ---- depth x (GlobalGraph -> relu -> residual -> LayerNorm) ----
        # TODO(synk): for very large N, tile the key dimension (flash-style
        # online softmax) so the [bbn, bbn] scores fit v7x's 64 MiB VMEM.
        for l in range(DEPTH):
            temp = xa                                      # f32 residual
            qkv = jnp.dot(xa.astype(MATMUL_DTYPE), qkv_w[l],
                          preferred_element_type=jnp.float32) + qkv_b[l][None, :]
            q = (qkv[:, 0:h] * scale).astype(MATMUL_DTYPE)
            k = qkv[:, h:2 * h].astype(MATMUL_DTYPE)
            v = qkv[:, 2 * h:3 * h].astype(MATMUL_DTYPE)

            ctx = jnp.zeros((bbn, h), jnp.float32)
            for i in range(NUM_HEADS):
                km = k * head_masks[i]                     # zero non-head lanes
                vm = v * head_masks[i]
                # scores_h = q_h @ k_h^T, via contraction over the (masked)
                # hidden lanes -- no explicit transpose / lane slice.
                scores = lax.dot_general(q, km, (((1,), (1,)), ((), ())),
                                         preferred_element_type=jnp.float32)
                scores = scores + bias
                scores = scores - jnp.max(scores, axis=-1, keepdims=True)
                p = jnp.exp(scores)
                p = p * pl.reciprocal(jnp.sum(p, axis=-1, keepdims=True),
                                      approx=True)
                # head context lands in its own lane slice (other lanes are 0)
                ctx = ctx + jnp.dot(p.astype(MATMUL_DTYPE), vm,
                                    preferred_element_type=jnp.float32)

            xa = jnp.maximum(ctx, 0.0) + temp
            xa = _layernorm(xa, ln_g[l], ln_b[l])

        out_ref[...] = xa.reshape(bb, n, h)                # leading split, free

    return kernel


def _choose_batch_block(B, N):
    # Fold enough sequences per grid step that the flattened matmul M dim
    # (bb*N) is >=128 rows, capped at the batch size.
    bb = max(1, min(B, _cdiv(128, N)))
    # Keep >=2 grid steps when there is enough work so both v7x TensorCores
    # (grid axis marked "parallel") get a share.
    if bb >= B and B >= 2 and B * N >= 256:
        bb = _cdiv(B, 2)
    return bb


def _pack_params(params):
    """Fuse Q/K/V weights and cast matmul operands to bf16 (wrapper side)."""
    qkv_w = jnp.concatenate([params["qw"], params["kw"], params["vw"]], axis=-1)
    qkv_b = jnp.concatenate([params["qb"], params["kb"], params["vb"]], axis=-1)
    return dict(
        mlp_w=params["mlp_w"].astype(MATMUL_DTYPE),
        mlp_b=params["mlp_b"].astype(jnp.float32),
        mlp_g=params["mlp_g"].astype(jnp.float32),
        mlp_beta=params["mlp_beta"].astype(jnp.float32),
        qkv_w=qkv_w.astype(MATMUL_DTYPE),
        qkv_b=qkv_b.astype(jnp.float32),
        ln2_g=params["ln2_g"].astype(jnp.float32),
        ln2_b=params["ln2_b"].astype(jnp.float32),
    )


def new_subgraph_forward(hidden_states, lengths, params):
    """hidden_states: [B, N, H] f32 padded ('merged') input; lengths: python ints."""
    B, N, H = hidden_states.shape
    packed = _pack_params(params)

    bb = _choose_batch_block(B, N)
    grid = _cdiv(B, bb)
    b_pad = grid * bb

    x = hidden_states.astype(MATMUL_DTYPE)
    if b_pad != B:  # pad batch with zero-length sequences (discarded below)
        x = jnp.pad(x, ((0, b_pad - B), (0, 0), (0, 0)))
    lens = jnp.asarray(list(lengths) + [0] * (b_pad - B), jnp.int32)

    def _w_spec(shape):
        nd = len(shape)
        return pl.BlockSpec(shape, lambda b, lens_ref, _nd=nd: (0,) * _nd)

    in_specs = [
        pl.BlockSpec((bb, N, H), lambda b, lens_ref: (b, 0, 0)),   # hidden block
        _w_spec((2, H, H)), _w_spec((2, H)),                       # layer_0(_again) linear
        _w_spec((2, H)), _w_spec((2, H)),                          # their LayerNorm gamma/beta
        _w_spec((DEPTH, H, 3 * H)), _w_spec((DEPTH, 3 * H)),       # fused QKV
        _w_spec((DEPTH, H)), _w_spec((DEPTH, H)),                  # layers_2 LayerNorm
    ]
    out_specs = pl.BlockSpec((bb, N, H), lambda b, lens_ref: (b, 0, 0))

    full = pl.pallas_call(
        _make_kernel(bb, N, H),
        out_shape=jax.ShapeDtypeStruct((b_pad, N, H), jnp.float32),
        grid_spec=pltpu.PrefetchScalarGridSpec(
            num_scalar_prefetch=1,          # lengths -> SMEM
            grid=(grid,),
            in_specs=in_specs,
            out_specs=out_specs,
        ),
        compiler_params=pltpu.CompilerParams(
            dimension_semantics=("parallel",)),
    )(lens, x,
      packed["mlp_w"], packed["mlp_b"], packed["mlp_g"], packed["mlp_beta"],
      packed["qkv_w"], packed["qkv_b"],
      packed["ln2_g"], packed["ln2_b"])

    full = full[:B]
    # Output 1: torch.max(hidden_states, dim=1)[0]  -> [B, H]  (over padded N,
    # matching the reference) -- computed in the wrapper, not a second tiny
    # masked-store output of the kernel.
    max_out = jnp.max(full, axis=1)
    # Output 2: torch.cat(de_merge_tensors(hidden_states, lengths)) -> [sum(len), H]
    # (ragged gather stays in plain JAX glue; lengths are static python ints)
    pieces = [full[b, :int(lengths[b]), :] for b in range(B)]
    cat_out = jnp.concatenate(pieces, axis=0)
    return max_out, cat_out


def _init_params(key, H):
    ks = jax.random.split(key, 8)
    scale = 0.05
    return dict(
        mlp_w=jax.random.normal(ks[0], (2, H, H), jnp.float32) * scale,
        mlp_b=jax.random.normal(ks[1], (2, H), jnp.float32) * scale,
        mlp_g=jnp.ones((2, H), jnp.float32),
        mlp_beta=jnp.zeros((2, H), jnp.float32),
        qw=jax.random.normal(ks[2], (DEPTH, H, H), jnp.float32) * scale,
        qb=jax.random.normal(ks[3], (DEPTH, H), jnp.float32) * scale,
        kw=jax.random.normal(ks[4], (DEPTH, H, H), jnp.float32) * scale,
        kb=jax.random.normal(ks[5], (DEPTH, H), jnp.float32) * scale,
        vw=jax.random.normal(ks[6], (DEPTH, H, H), jnp.float32) * scale,
        vb=jax.random.normal(ks[7], (DEPTH, H), jnp.float32) * scale,
        ln2_g=jnp.ones((DEPTH, H), jnp.float32),
        ln2_b=jnp.zeros((DEPTH, H), jnp.float32),
    )


if __name__ == "__main__":
    key = jax.random.PRNGKey(0)
    kp, k0, k1 = jax.random.split(key, 3)

    B, N, H = 2, 8, HIDDEN
    lengths = [8, 5]          # ragged sequence lengths (merge_tensors pads to N)

    params = _init_params(kp, H)

    # Build the padded "merged" hidden states from a ragged input list.
    x0 = jax.random.normal(k0, (lengths[0], H), jnp.float32)
    x1 = jax.random.normal(k1, (lengths[1], H), jnp.float32)
    hidden = jnp.zeros((B, N, H), jnp.float32)
    hidden = hidden.at[0, :lengths[0]].set(x0)
    hidden = hidden.at[1, :lengths[1]].set(x1)

    max_out, cat_out = new_subgraph_forward(hidden, lengths, params)
    jax.block_until_ready((max_out, cat_out))

    assert max_out.shape == (B, H)
    assert cat_out.shape == (sum(lengths), H)
    assert bool(jnp.all(jnp.isfinite(max_out)))
    assert bool(jnp.all(jnp.isfinite(cat_out)))
    print("KERNEL_OK")
</pallas_src>

<mosaic_0001>
module attributes {stable_mosaic.version = 11 : i64} {
  func.func @kernel(%arg0: i32, %arg1: memref<2xi32, #tpu.memory_space<smem>>, %arg2: memref<2x8x32xbf16, #tpu.memory_space<vmem>>, %arg3: memref<2x32x32xbf16, #tpu.memory_space<vmem>>, %arg4: memref<2x32xf32, #tpu.memory_space<vmem>>, %arg5: memref<2x32xf32, #tpu.memory_space<vmem>>, %arg6: memref<2x32xf32, #tpu.memory_space<vmem>>, %arg7: memref<3x32x96xbf16, #tpu.memory_space<vmem>>, %arg8: memref<3x96xf32, #tpu.memory_space<vmem>>, %arg9: memref<3x32xf32, #tpu.memory_space<vmem>>, %arg10: memref<3x32xf32, #tpu.memory_space<vmem>>, %arg11: memref<2x8x32xf32, #tpu.memory_space<vmem>>) attributes {dimension_semantics = [#tpu.dimension_semantics<parallel>], iteration_bounds = array<i64: 1>, scalar_prefetch = 1 : i64, scratch_operands = 0 : i64, tpu.core_type = #tpu.core_type<tc>, window_params = [{transform_indices = @transform_0, window_bounds = array<i64: 2, 8, 32>}, {pipeline_mode = #tpu.pipeline_mode<synchronous>, transform_indices = @transform_1, window_bounds = array<i64: 2, 32, 32>}, {pipeline_mode = #tpu.pipeline_mode<synchronous>, transform_indices = @transform_2, window_bounds = array<i64: 2, 32>}, {pipeline_mode = #tpu.pipeline_mode<synchronous>, transform_indices = @transform_3, window_bounds = array<i64: 2, 32>}, {pipeline_mode = #tpu.pipeline_mode<synchronous>, transform_indices = @transform_4, window_bounds = array<i64: 2, 32>}, {pipeline_mode = #tpu.pipeline_mode<synchronous>, transform_indices = @transform_5, window_bounds = array<i64: 3, 32, 96>}, {pipeline_mode = #tpu.pipeline_mode<synchronous>, transform_indices = @transform_6, window_bounds = array<i64: 3, 96>}, {pipeline_mode = #tpu.pipeline_mode<synchronous>, transform_indices = @transform_7, window_bounds = array<i64: 3, 32>}, {pipeline_mode = #tpu.pipeline_mode<synchronous>, transform_indices = @transform_8, window_bounds = array<i64: 3, 32>}, {transform_indices = @transform_9, window_bounds = array<i64: 2, 8, 32>}]} {
    %c2_i32 = arith.constant 2 : i32
    %0 = arith.muli %arg0, %c2_i32 : i32
    %c0 = arith.constant 0 : index
    %c0_0 = arith.constant 0 : index
    %c0_1 = arith.constant 0 : index
    %1 = vector.load %arg2[%c0, %c0_0, %c0_1] : memref<2x8x32xbf16, #tpu.memory_space<vmem>>, vector<2x8x32xbf16>
    %2 = vector.shape_cast %1 : vector<2x8x32xbf16> to vector<16x32xbf16>
    %c0_2 = arith.constant 0 : index
    %c0_3 = arith.constant 0 : index
    %c0_4 = arith.constant 0 : index
    %3 = vector.load %arg3[%c0_2, %c0_3, %c0_4] : memref<2x32x32xbf16, #tpu.memory_space<vmem>>, vector<2x32x32xbf16>
    %c0_5 = arith.constant 0 : index
    %c0_6 = arith.constant 0 : index
    %4 = vector.load %arg4[%c0_5, %c0_6] : memref<2x32xf32, #tpu.memory_space<vmem>>, vector<2x32xf32>
    %c0_7 = arith.constant 0 : index
    %c0_8 = arith.constant 0 : index
    %5 = vector.load %arg5[%c0_7, %c0_8] : memref<2x32xf32, #tpu.memory_space<vmem>>, vector<2x32xf32>
    %c0_9 = arith.constant 0 : index
    %c0_10 = arith.constant 0 : index
    %6 = vector.load %arg6[%c0_9, %c0_10] : memref<2x32xf32, #tpu.memory_space<vmem>>, vector<2x32xf32>
    %c0_11 = arith.constant 0 : index
    %c0_12 = arith.constant 0 : index
    %c0_13 = arith.constant 0 : index
    %7 = vector.load %arg7[%c0_11, %c0_12, %c0_13] : memref<3x32x96xbf16, #tpu.memory_space<vmem>>, vector<3x32x96xbf16>
    %c0_14 = arith.constant 0 : index
    %c0_15 = arith.constant 0 : index
    %8 = vector.load %arg8[%c0_14, %c0_15] : memref<3x96xf32, #tpu.memory_space<vmem>>, vector<3x96xf32>
    %c0_16 = arith.constant 0 : index
    %c0_17 = arith.constant 0 : index
    %9 = vector.load %arg9[%c0_16, %c0_17] : memref<3x32xf32, #tpu.memory_space<vmem>>, vector<3x32xf32>
    %c0_18 = arith.constant 0 : index
    %c0_19 = arith.constant 0 : index
    %10 = vector.load %arg10[%c0_18, %c0_19] : memref<3x32xf32, #tpu.memory_space<vmem>>, vector<3x32xf32>
    %11 = vector.extract_strided_slice %3 {offsets = [0, 0, 0], sizes = [1, 32, 32], strides = [1, 1, 1]} : vector<2x32x32xbf16> to vector<1x32x32xbf16>
    %12 = vector.shape_cast %11 : vector<1x32x32xbf16> to vector<32x32xbf16>
    %cst = arith.constant dense<0.000000e+00> : vector<16x32xf32>
    %13 = tpu.matmul %2, %12, %cst {dimension_numbers = #tpu.dot_dimension_numbers<[1], [0], [0], [1], [0, 0, 1, 1], [], []>} : vector<16x32xbf16>, vector<32x32xbf16>, vector<16x32xf32> -> vector<16x32xf32>
    %14 = vector.extract_strided_slice %4 {offsets = [0, 0], sizes = [1, 32], strides = [1, 1]} : vector<2x32xf32> to vector<1x32xf32>
    %15 = vector.shape_cast %14 : vector<1x32xf32> to vector<32xf32>
    %16 = vector.shape_cast %15 : vector<32xf32> to vector<1x32xf32>
    %17 = vector.broadcast %16 : vector<1x32xf32> to vector<16x32xf32>
    %18 = arith.addf %13, %17 : vector<16x32xf32>
    %19 = vector.extract_strided_slice %5 {offsets = [0, 0], sizes = [1, 32], strides = [1, 1]} : vector<2x32xf32> to vector<1x32xf32>
    %20 = vector.shape_cast %19 : vector<1x32xf32> to vector<32xf32>
    %21 = vector.extract_strided_slice %6 {offsets = [0, 0], sizes = [1, 32], strides = [1, 1]} : vector<2x32xf32> to vector<1x32xf32>
    %22 = vector.shape_cast %21 : vector<1x32xf32> to vector<32xf32>
    %cst_20 = arith.constant dense<0.000000e+00> : vector<16xf32>
    %23 = vector.multi_reduction <add>, %18, %cst_20 [1] : vector<16x32xf32> to vector<16xf32>
    %24 = vector.shape_cast %23 : vector<16xf32> to vector<16x1xf32>
    %cst_21 = arith.constant 3.200000e+01 : f32
    %25 = vector.broadcast %cst_21 : f32 to vector<16x1xf32>
    %26 = arith.divf %24, %25 : vector<16x1xf32>
    %27 = vector.broadcast %26 : vector<16x1xf32> to vector<16x32xf32>
    %28 = arith.subf %18, %27 : vector<16x32xf32>
    %29 = arith.mulf %28, %28 : vector<16x32xf32>
    %cst_22 = arith.constant dense<0.000000e+00> : vector<16xf32>
    %30 = vector.multi_reduction <add>, %29, %cst_22 [1] : vector<16x32xf32> to vector<16xf32>
    %31 = vector.shape_cast %30 : vector<16xf32> to vector<16x1xf32>
    %cst_23 = arith.constant 3.200000e+01 : f32
    %32 = vector.broadcast %cst_23 : f32 to vector<16x1xf32>
    %33 = arith.divf %31, %32 : vector<16x1xf32>
    %34 = vector.broadcast %26 : vector<16x1xf32> to vector<16x32xf32>
    %35 = arith.subf %18, %34 : vector<16x32xf32>
    %cst_24 = arith.constant 9.99999974E-6 : f32
    %36 = vector.broadcast %cst_24 : f32 to vector<16x1xf32>
    %37 = arith.addf %33, %36 : vector<16x1xf32>
    %38 = math.sqrt %37 : vector<16x1xf32>
    %39 = vector.broadcast %38 : vector<16x1xf32> to vector<16x32xf32>
    %40 = arith.divf %35, %39 : vector<16x32xf32>
    %41 = vector.shape_cast %20 : vector<32xf32> to vector<1x32xf32>
    %42 = vector.broadcast %41 : vector<1x32xf32> to vector<16x32xf32>
    %43 = arith.mulf %42, %40 : vector<16x32xf32>
    %44 = vector.shape_cast %22 : vector<32xf32> to vector<1x32xf32>
    %45 = vector.broadcast %44 : vector<1x32xf32> to vector<16x32xf32>
    %46 = arith.addf %43, %45 : vector<16x32xf32>
    %cst_25 = arith.constant 0.000000e+00 : f32
    %47 = vector.broadcast %cst_25 : f32 to vector<16x32xf32>
    %48 = arith.maximumf %46, %47 : vector<16x32xf32>
    %49 = arith.truncf %48 : vector<16x32xf32> to vector<16x32xbf16>
    %50 = vector.extract_strided_slice %3 {offsets = [1, 0, 0], sizes = [1, 32, 32], strides = [1, 1, 1]} : vector<2x32x32xbf16> to vector<1x32x32xbf16>
    %51 = vector.shape_cast %50 : vector<1x32x32xbf16> to vector<32x32xbf16>
    %cst_26 = arith.constant dense<0.000000e+00> : vector<16x32xf32>
    %52 = tpu.matmul %49, %51, %cst_26 {dimension_numbers = #tpu.dot_dimension_numbers<[1], [0], [0], [1], [0, 0, 1, 1], [], []>} : vector<16x32xbf16>, vector<32x32xbf16>, vector<16x32xf32> -> vector<16x32xf32>
    %53 = vector.extract_strided_slice %4 {offsets = [1, 0], sizes = [1, 32], strides = [1, 1]} : vector<2x32xf32> to vector<1x32xf32>
    %54 = vector.shape_cast %53 : vector<1x32xf32> to vector<32xf32>
    %55 = vector.shape_cast %54 : vector<32xf32> to vector<1x32xf32>
    %56 = vector.broadcast %55 : vector<1x32xf32> to vector<16x32xf32>
    %57 = arith.addf %52, %56 : vector<16x32xf32>
    %58 = vector.extract_strided_slice %5 {offsets = [1, 0], sizes = [1, 32], strides = [1, 1]} : vector<2x32xf32> to vector<1x32xf32>
    %59 = vector.shape_cast %58 : vector<1x32xf32> to vector<32xf32>
    %60 = vector.extract_strided_slice %6 {offsets = [1, 0], sizes = [1, 32], strides = [1, 1]} : vector<2x32xf32> to vector<1x32xf32>
    %61 = vector.shape_cast %60 : vector<1x32xf32> to vector<32xf32>
    %cst_27 = arith.constant dense<0.000000e+00> : vector<16xf32>
    %62 = vector.multi_reduction <add>, %57, %cst_27 [1] : vector<16x32xf32> to vector<16xf32>
    %63 = vector.shape_cast %62 : vector<16xf32> to vector<16x1xf32>
    %cst_28 = arith.constant 3.200000e+01 : f32
    %64 = vector.broadcast %cst_28 : f32 to vector<16x1xf32>
    %65 = arith.divf %63, %64 : vector<16x1xf32>
    %66 = vector.broadcast %65 : vector<16x1xf32> to vector<16x32xf32>
    %67 = arith.subf %57, %66 : vector<16x32xf32>
    %68 = arith.mulf %67, %67 : vector<16x32xf32>
    %cst_29 = arith.constant dense<0.000000e+00> : vector<16xf32>
    %69 = vector.multi_reduction <add>, %68, %cst_29 [1] : vector<16x32xf32> to vector<16xf32>
    %70 = vector.shape_cast %69 : vector<16xf32> to vector<16x1xf32>
    %cst_30 = arith.constant 3.200000e+01 : f32
    %71 = vector.broadcast %cst_30 : f32 to vector<16x1xf32>
    %72 = arith.divf %70, %71 : vector<16x1xf32>
    %73 = vector.broadcast %65 : vector<16x1xf32> to vector<16x32xf32>
    %74 = arith.subf %57, %73 : vector<16x32xf32>
    %cst_31 = arith.constant 9.99999974E-6 : f32
    %75 = vector.broadcast %cst_31 : f32 to vector<16x1xf32>
    %76 = arith.addf %72, %75 : vector<16x1xf32>
    %77 = math.sqrt %76 : vector<16x1xf32>
    %78 = vector.broadcast %77 : vector<16x1xf32> to vector<16x32xf32>
    %79 = arith.divf %74, %78 : vector<16x32xf32>
    %80 = vector.shape_cast %59 : vector<32xf32> to vector<1x32xf32>
    %81 = vector.broadcast %80 : vector<1x32xf32> to vector<16x32xf32>
    %82 = arith.mulf %81, %79 : vector<16x32xf32>
    %83 = vector.shape_cast %61 : vector<32xf32> to vector<1x32xf32>
    %84 = vector.broadcast %83 : vector<1x32xf32> to vector<16x32xf32>
    %85 = arith.addf %82, %84 : vector<16x32xf32>
    %cst_32 = arith.constant 0.000000e+00 : f32
    %86 = vector.broadcast %cst_32 : f32 to vector<16x32xf32>
    %87 = arith.maximumf %85, %86 : vector<16x32xf32>
    %88 = tpu.iota {dimensions = array<i32: 0>} : vector<8x1xi32>
    %89 = tpu.iota {dimensions = array<i32: 1>} : vector<1x8xi32>
    %c0_i32 = arith.constant 0 : i32
    %90 = arith.addi %0, %c0_i32 : i32
    %91 = arith.index_cast %90 : i32 to index
    %92 = memref.load %arg1[%91] : memref<2xi32, #tpu.memory_space<smem>>
    %93 = vector.broadcast %92 : i32 to vector<8x1xi32>
    %94 = arith.cmpi slt, %88, %93 : vector<8x1xi32>
    %95 = arith.extui %94 : vector<8x1xi1> to vector<8x1xi32>
    %96 = arith.sitofp %95 : vector<8x1xi32> to vector<8x1xf32>
    %97 = vector.broadcast %92 : i32 to vector<1x8xi32>
    %98 = arith.cmpi slt, %89, %97 : vector<1x8xi32>
    %99 = arith.extui %98 : vector<1x8xi1> to vector<1x8xi32>
    %100 = arith.sitofp %99 : vector<1x8xi32> to vector<1x8xf32>
    %c1_i32 = arith.constant 1 : i32
    %101 = arith.addi %0, %c1_i32 : i32
    %102 = arith.index_cast %101 : i32 to index
    %103 = memref.load %arg1[%102] : memref<2xi32, #tpu.memory_space<smem>>
    %104 = vector.broadcast %103 : i32 to vector<8x1xi32>
    %105 = arith.cmpi slt, %88, %104 : vector<8x1xi32>
    %106 = arith.extui %105 : vector<8x1xi1> to vector<8x1xi32>
    %107 = arith.sitofp %106 : vector<8x1xi32> to vector<8x1xf32>
    %108 = vector.broadcast %103 : i32 to vector<1x8xi32>
    %109 = arith.cmpi slt, %89, %108 : vector<1x8xi32>
    %110 = arith.extui %109 : vector<1x8xi1> to vector<1x8xi32>
    %111 = arith.sitofp %110 : vector<1x8xi32> to vector<1x8xf32>
    %112 = tpu.concatenate %96, %107 in 0 : vector<8x1xf32>, vector<8x1xf32> -> vector<16x1xf32>
    %113 = tpu.concatenate %100, %111 in 1 : vector<1x8xf32>, vector<1x8xf32> -> vector<1x16xf32>
    %114 = vector.broadcast %112 : vector<16x1xf32> to vector<16x16xf32>
    %115 = vector.broadcast %113 : vector<1x16xf32> to vector<16x16xf32>
    %116 = arith.mulf %114, %115 : vector<16x16xf32>
    %c0_i32_33 = arith.constant 0 : i32
    %117 = vector.broadcast %c0_i32_33 : i32 to vector<8x1xi32>
    %c1_i32_34 = arith.constant 1 : i32
    %118 = vector.broadcast %c1_i32_34 : i32 to vector<8x1xi32>
    %119 = tpu.concatenate %117, %118 in 0 : vector<8x1xi32>, vector<8x1xi32> -> vector<16x1xi32>
    %c0_i32_35 = arith.constant 0 : i32
    %120 = vector.broadcast %c0_i32_35 : i32 to vector<1x8xi32>
    %c1_i32_36 = arith.constant 1 : i32
    %121 = vector.broadcast %c1_i32_36 : i32 to vector<1x8xi32>
    %122 = tpu.concatenate %120, %121 in 1 : vector<1x8xi32>, vector<1x8xi32> -> vector<1x16xi32>
    %123 = vector.broadcast %119 : vector<16x1xi32> to vector<16x16xi32>
    %124 = vector.broadcast %122 : vector<1x16xi32> to vector<16x16xi32>
    %125 = arith.cmpi eq, %123, %124 : vector<16x16xi32>
    %126 = arith.extui %125 : vector<16x16xi1> to vector<16x16xi32>
    %127 = arith.sitofp %126 : vector<16x16xi32> to vector<16x16xf32>
    %cst_37 = arith.constant 1.000000e+00 : f32
    %128 = vector.broadcast %cst_37 : f32 to vector<16x16xf32>
    %129 = arith.subf %128, %116 : vector<16x16xf32>
    %130 = arith.mulf %127, %129 : vector<16x16xf32>
    %cst_38 = arith.constant -1.000000e+04 : f32
    %131 = vector.broadcast %cst_38 : f32 to vector<16x16xf32>
    %132 = arith.mulf %130, %131 : vector<16x16xf32>
    %cst_39 = arith.constant 1.000000e+00 : f32
    %133 = vector.broadcast %cst_39 : f32 to vector<16x16xf32>
    %134 = arith.subf %133, %127 : vector<16x16xf32>
    %cst_40 = arith.constant -1.000000e+09 : f32
    %135 = vector.broadcast %cst_40 : f32 to vector<16x16xf32>
    %136 = arith.mulf %134, %135 : vector<16x16xf32>
    %137 = arith.addf %132, %136 : vector<16x16xf32>
    %138 = tpu.iota {dimensions = array<i32: 1>} : vector<1x32xi32>
    %c0_i32_41 = arith.constant 0 : i32
    %139 = vector.broadcast %c0_i32_41 : i32 to vector<1x32xi32>
    %140 = arith.cmpi sge, %138, %139 : vector<1x32xi32>
    %c16_i32 = arith.constant 16 : i32
    %141 = vector.broadcast %c16_i32 : i32 to vector<1x32xi32>
    %142 = arith.cmpi slt, %138, %141 : vector<1x32xi32>
    %143 = arith.andi %140, %142 : vector<1x32xi1>
    %144 = arith.extui %143 : vector<1x32xi1> to vector<1x32xi32>
    %145 = arith.sitofp %144 : vector<1x32xi32> to vector<1x32xf32>
    %146 = arith.truncf %145 : vector<1x32xf32> to vector<1x32xbf16>
    %c16_i32_42 = arith.constant 16 : i32
    %147 = vector.broadcast %c16_i32_42 : i32 to vector<1x32xi32>
    %148 = arith.cmpi sge, %138, %147 : vector<1x32xi32>
    %c32_i32 = arith.constant 32 : i32
    %149 = vector.broadcast %c32_i32 : i32 to vector<1x32xi32>
    %150 = arith.cmpi slt, %138, %149 : vector<1x32xi32>
    %151 = arith.andi %148, %150 : vector<1x32xi1>
    %152 = arith.extui %151 : vector<1x32xi1> to vector<1x32xi32>
    %153 = arith.sitofp %152 : vector<1x32xi32> to vector<1x32xf32>
    %154 = arith.truncf %153 : vector<1x32xf32> to vector<1x32xbf16>
    %155 = arith.truncf %87 : vector<16x32xf32> to vector<16x32xbf16>
    %156 = vector.extract_strided_slice %7 {offsets = [0, 0, 0], sizes = [1, 32, 96], strides = [1, 1, 1]} : vector<3x32x96xbf16> to vector<1x32x96xbf16>
    %157 = vector.shape_cast %156 : vector<1x32x96xbf16> to vector<32x96xbf16>
    %cst_43 = arith.constant dense<0.000000e+00> : vector<16x96xf32>
    %158 = tpu.matmul %155, %157, %cst_43 {dimension_numbers = #tpu.dot_dimension_numbers<[1], [0], [0], [1], [0, 0, 1, 1], [], []>} : vector<16x32xbf16>, vector<32x96xbf16>, vector<16x96xf32> -> vector<16x96xf32>
    %159 = vector.extract_strided_slice %8 {offsets = [0, 0], sizes = [1, 96], strides = [1, 1]} : vector<3x96xf32> to vector<1x96xf32>
    %160 = vector.shape_cast %159 : vector<1x96xf32> to vector<96xf32>
    %161 = vector.shape_cast %160 : vector<96xf32> to vector<1x96xf32>
    %162 = vector.broadcast %161 : vector<1x96xf32> to vector<16x96xf32>
    %163 = arith.addf %158, %162 : vector<16x96xf32>
    %164 = vector.extract_strided_slice %163 {offsets = [0, 0], sizes = [16, 32], strides = [1, 1]} : vector<16x96xf32> to vector<16x32xf32>
    %cst_44 = arith.constant 2.500000e-01 : f32
    %165 = vector.broadcast %cst_44 : f32 to vector<16x32xf32>
    %166 = arith.mulf %164, %165 : vector<16x32xf32>
    %167 = arith.truncf %166 : vector<16x32xf32> to vector<16x32xbf16>
    %168 = vector.extract_strided_slice %163 {offsets = [0, 32], sizes = [16, 32], strides = [1, 1]} : vector<16x96xf32> to vector<16x32xf32>
    %169 = arith.truncf %168 : vector<16x32xf32> to vector<16x32xbf16>
    %170 = vector.extract_strided_slice %163 {offsets = [0, 64], sizes = [16, 32], strides = [1, 1]} : vector<16x96xf32> to vector<16x32xf32>
    %171 = arith.truncf %170 : vector<16x32xf32> to vector<16x32xbf16>
    %cst_45 = arith.constant 0.000000e+00 : f32
    %172 = vector.broadcast %cst_45 : f32 to vector<16x32xf32>
    %173 = vector.broadcast %146 : vector<1x32xbf16> to vector<16x32xbf16>
    %174 = arith.mulf %169, %173 : vector<16x32xbf16>
    %175 = vector.broadcast %146 : vector<1x32xbf16> to vector<16x32xbf16>
    %176 = arith.mulf %171, %175 : vector<16x32xbf16>
    %cst_46 = arith.constant dense<0.000000e+00> : vector<16x16xf32>
    %177 = tpu.matmul %167, %174, %cst_46 {dimension_numbers = #tpu.dot_dimension_numbers<[1], [1], [0], [0], [0, 0, 1, 0], [], []>} : vector<16x32xbf16>, vector<16x32xbf16>, vector<16x16xf32> -> vector<16x16xf32>
    %178 = arith.addf %177, %137 : vector<16x16xf32>
    %cst_47 = arith.constant dense<0xFF800000> : vector<16xf32>
    %179 = vector.multi_reduction <maximumf>, %178, %cst_47 [1] : vector<16x16xf32> to vector<16xf32>
    %180 = vector.shape_cast %179 : vector<16xf32> to vector<16x1xf32>
    %181 = vector.broadcast %180 : vector<16x1xf32> to vector<16x16xf32>
    %182 = arith.subf %178, %181 : vector<16x16xf32>
    %183 = math.exp %182 : vector<16x16xf32>
    %cst_48 = arith.constant dense<0.000000e+00> : vector<16xf32>
    %184 = vector.multi_reduction <add>, %183, %cst_48 [1] : vector<16x16xf32> to vector<16xf32>
    %185 = vector.shape_cast %184 : vector<16xf32> to vector<16x1xf32>
    %186 = tpu.reciprocal %185 {approx = true} : vector<16x1xf32> -> vector<16x1xf32>
    %187 = vector.broadcast %186 : vector<16x1xf32> to vector<16x16xf32>
    %188 = arith.mulf %183, %187 : vector<16x16xf32>
    %189 = arith.truncf %188 : vector<16x16xf32> to vector<16x16xbf16>
    %cst_49 = arith.constant dense<0.000000e+00> : vector<16x32xf32>
    %190 = tpu.matmul %189, %176, %cst_49 {dimension_numbers = #tpu.dot_dimension_numbers<[1], [0], [0], [1], [0, 0, 1, 1], [], []>} : vector<16x16xbf16>, vector<16x32xbf16>, vector<16x32xf32> -> vector<16x32xf32>
    %191 = arith.addf %172, %190 : vector<16x32xf32>
    %192 = vector.broadcast %154 : vector<1x32xbf16> to vector<16x32xbf16>
    %193 = arith.mulf %169, %192 : vector<16x32xbf16>
    %194 = vector.broadcast %154 : vector<1x32xbf16> to vector<16x32xbf16>
    %195 = arith.mulf %171, %194 : vector<16x32xbf16>
    %cst_50 = arith.constant dense<0.000000e+00> : vector<16x16xf32>
    %196 = tpu.matmul %167, %193, %cst_50 {dimension_numbers = #tpu.dot_dimension_numbers<[1], [1], [0], [0], [0, 0, 1, 0], [], []>} : vector<16x32xbf16>, vector<16x32xbf16>, vector<16x16xf32> -> vector<16x16xf32>
    %197 = arith.addf %196, %137 : vector<16x16xf32>
    %cst_51 = arith.constant dense<0xFF800000> : vector<16xf32>
    %198 = vector.multi_reduction <maximumf>, %197, %cst_51 [1] : vector<16x16xf32> to vector<16xf32>
    %199 = vector.shape_cast %198 : vector<16xf32> to vector<16x1xf32>
    %200 = vector.broadcast %199 : vector<16x1xf32> to vector<16x16xf32>
    %201 = arith.subf %197, %200 : vector<16x16xf32>
    %202 = math.exp %201 : vector<16x16xf32>
    %cst_52 = arith.constant dense<0.000000e+00> : vector<16xf32>
    %203 = vector.multi_reduction <add>, %202, %cst_52 [1] : vector<16x16xf32> to vector<16xf32>
    %204 = vector.shape_cast %203 : vector<16xf32> to vector<16x1xf32>
    %205 = tpu.reciprocal %204 {approx = true} : vector<16x1xf32> -> vector<16x1xf32>
    %206 = vector.broadcast %205 : vector<16x1xf32> to vector<16x16xf32>
    %207 = arith.mulf %202, %206 : vector<16x16xf32>
    %208 = arith.truncf %207 : vector<16x16xf32> to vector<16x16xbf16>
    %cst_53 = arith.constant dense<0.000000e+00> : vector<16x32xf32>
    %209 = tpu.matmul %208, %195, %cst_53 {dimension_numbers = #tpu.dot_dimension_numbers<[1], [0], [0], [1], [0, 0, 1, 1], [], []>} : vector<16x16xbf16>, vector<16x32xbf16>, vector<16x32xf32> -> vector<16x32xf32>
    %210 = arith.addf %191, %209 : vector<16x32xf32>
    %cst_54 = arith.constant 0.000000e+00 : f32
    %211 = vector.broadcast %cst_54 : f32 to vector<16x32xf32>
    %212 = arith.maximumf %210, %211 : vector<16x32xf32>
    %213 = arith.addf %212, %87 : vector<16x32xf32>
    %214 = vector.extract_strided_slice %9 {offsets = [0, 0], sizes = [1, 32], strides = [1, 1]} : vector<3x32xf32> to vector<1x32xf32>
    %215 = vector.shape_cast %214 : vector<1x32xf32> to vector<32xf32>
    %216 = vector.extract_strided_slice %10 {offsets = [0, 0], sizes = [1, 32], strides = [1, 1]} : vector<3x32xf32> to vector<1x32xf32>
    %217 = vector.shape_cast %216 : vector<1x32xf32> to vector<32xf32>
    %cst_55 = arith.constant dense<0.000000e+00> : vector<16xf32>
    %218 = vector.multi_reduction <add>, %213, %cst_55 [1] : vector<16x32xf32> to vector<16xf32>
    %219 = vector.shape_cast %218 : vector<16xf32> to vector<16x1xf32>
    %cst_56 = arith.constant 3.200000e+01 : f32
    %220 = vector.broadcast %cst_56 : f32 to vector<16x1xf32>
    %221 = arith.divf %219, %220 : vector<16x1xf32>
    %222 = vector.broadcast %221 : vector<16x1xf32> to vector<16x32xf32>
    %223 = arith.subf %213, %222 : vector<16x32xf32>
    %224 = arith.mulf %223, %223 : vector<16x32xf32>
    %cst_57 = arith.constant dense<0.000000e+00> : vector<16xf32>
    %225 = vector.multi_reduction <add>, %224, %cst_57 [1] : vector<16x32xf32> to vector<16xf32>
    %226 = vector.shape_cast %225 : vector<16xf32> to vector<16x1xf32>
    %cst_58 = arith.constant 3.200000e+01 : f32
    %227 = vector.broadcast %cst_58 : f32 to vector<16x1xf32>
    %228 = arith.divf %226, %227 : vector<16x1xf32>
    %229 = vector.broadcast %221 : vector<16x1xf32> to vector<16x32xf32>
    %230 = arith.subf %213, %229 : vector<16x32xf32>
    %cst_59 = arith.constant 9.99999974E-6 : f32
    %231 = vector.broadcast %cst_59 : f32 to vector<16x1xf32>
    %232 = arith.addf %228, %231 : vector<16x1xf32>
    %233 = math.sqrt %232 : vector<16x1xf32>
    %234 = vector.broadcast %233 : vector<16x1xf32> to vector<16x32xf32>
    %235 = arith.divf %230, %234 : vector<16x32xf32>
    %236 = vector.shape_cast %215 : vector<32xf32> to vector<1x32xf32>
    %237 = vector.broadcast %236 : vector<1x32xf32> to vector<16x32xf32>
    %238 = arith.mulf %237, %235 : vector<16x32xf32>
    %239 = vector.shape_cast %217 : vector<32xf32> to vector<1x32xf32>
    %240 = vector.broadcast %239 : vector<1x32xf32> to vector<16x32xf32>
    %241 = arith.addf %238, %240 : vector<16x32xf32>
    %242 = arith.truncf %241 : vector<16x32xf32> to vector<16x32xbf16>
    %243 = vector.extract_strided_slice %7 {offsets = [1, 0, 0], sizes = [1, 32, 96], strides = [1, 1, 1]} : vector<3x32x96xbf16> to vector<1x32x96xbf16>
    %244 = vector.shape_cast %243 : vector<1x32x96xbf16> to vector<32x96xbf16>
    %cst_60 = arith.constant dense<0.000000e+00> : vector<16x96xf32>
    %245 = tpu.matmul %242, %244, %cst_60 {dimension_numbers = #tpu.dot_dimension_numbers<[1], [0], [0], [1], [0, 0, 1, 1], [], []>} : vector<16x32xbf16>, vector<32x96xbf16>, vector<16x96xf32> -> vector<16x96xf32>
    %246 = vector.extract_strided_slice %8 {offsets = [1, 0], sizes = [1, 96], strides = [1, 1]} : vector<3x96xf32> to vector<1x96xf32>
    %247 = vector.shape_cast %246 : vector<1x96xf32> to vector<96xf32>
    %248 = vector.shape_cast %247 : vector<96xf32> to vector<1x96xf32>
    %249 = vector.broadcast %248 : vector<1x96xf32> to vector<16x96xf32>
    %250 = arith.addf %245, %249 : vector<16x96xf32>
    %251 = vector.extract_strided_slice %250 {offsets = [0, 0], sizes = [16, 32], strides = [1, 1]} : vector<16x96xf32> to vector<16x32xf32>
    %cst_61 = arith.constant 2.500000e-01 : f32
    %252 = vector.broadcast %cst_61 : f32 to vector<16x32xf32>
    %253 = arith.mulf %251, %252 : vector<16x32xf32>
    %254 = arith.truncf %253 : vector<16x32xf32> to vector<16x32xbf16>
    %255 = vector.extract_strided_slice %250 {offsets = [0, 32], sizes = [16, 32], strides = [1, 1]} : vector<16x96xf32> to vector<16x32xf32>
    %256 = arith.truncf %255 : vector<16x32xf32> to vector<16x32xbf16>
    %257 = vector.extract_strided_slice %250 {offsets = [0, 64], sizes = [16, 32], strides = [1, 1]} : vector<16x96xf32> to vector<16x32xf32>
    %258 = arith.truncf %257 : vector<16x32xf32> to vector<16x32xbf16>
    %cst_62 = arith.constant 0.000000e+00 : f32
    %259 = vector.broadcast %cst_62 : f32 to vector<16x32xf32>
    %260 = vector.broadcast %146 : vector<1x32xbf16> to vector<16x32xbf16>
    %261 = arith.mulf %256, %260 : vector<16x32xbf16>
    %262 = vector.broadcast %146 : vector<1x32xbf16> to vector<16x32xbf16>
    %263 = arith.mulf %258, %262 : vector<16x32xbf16>
    %cst_63 = arith.constant dense<0.000000e+00> : vector<16x16xf32>
    %264 = tpu.matmul %254, %261, %cst_63 {dimension_numbers = #tpu.dot_dimension_numbers<[1], [1], [0], [0], [0, 0, 1, 0], [], []>} : vector<16x32xbf16>, vector<16x32xbf16>, vector<16x16xf32> -> vector<16x16xf32>
    %265 = arith.addf %264, %137 : vector<16x16xf32>
    %cst_64 = arith.constant dense<0xFF800000> : vector<16xf32>
    %266 = vector.multi_reduction <maximumf>, %265, %cst_64 [1] : vector<16x16xf32> to vector<16xf32>
    %267 = vector.shape_cast %266 : vector<16xf32> to vector<16x1xf32>
    %268 = vector.broadcast %267 : vector<16x1xf32> to vector<16x16xf32>
    %269 = arith.subf %265, %268 : vector<16x16xf32>
    %270 = math.exp %269 : vector<16x16xf32>
    %cst_65 = arith.constant dense<0.000000e+00> : vector<16xf32>
    %271 = vector.multi_reduction <add>, %270, %cst_65 [1] : vector<16x16xf32> to vector<16xf32>
    %272 = vector.shape_cast %271 : vector<16xf32> to vector<16x1xf32>
    %273 = tpu.reciprocal %272 {approx = true} : vector<16x1xf32> -> vector<16x1xf32>
    %274 = vector.broadcast %273 : vector<16x1xf32> to vector<16x16xf32>
    %275 = arith.mulf %270, %274 : vector<16x16xf32>
    %276 = arith.truncf %275 : vector<16x16xf32> to vector<16x16xbf16>
    %cst_66 = arith.constant dense<0.000000e+00> : vector<16x32xf32>
    %277 = tpu.matmul %276, %263, %cst_66 {dimension_numbers = #tpu.dot_dimension_numbers<[1], [0], [0], [1], [0, 0, 1, 1], [], []>} : vector<16x16xbf16>, vector<16x32xbf16>, vector<16x32xf32> -> vector<16x32xf32>
    %278 = arith.addf %259, %277 : vector<16x32xf32>
    %279 = vector.broadcast %154 : vector<1x32xbf16> to vector<16x32xbf16>
    %280 = arith.mulf %256, %279 : vector<16x32xbf16>
    %281 = vector.broadcast %154 : vector<1x32xbf16> to vector<16x32xbf16>
    %282 = arith.mulf %258, %281 : vector<16x32xbf16>
    %cst_67 = arith.constant dense<0.000000e+00> : vector<16x16xf32>
    %283 = tpu.matmul %254, %280, %cst_67 {dimension_numbers = #tpu.dot_dimension_numbers<[1], [1], [0], [0], [0, 0, 1, 0], [], []>} : vector<16x32xbf16>, vector<16x32xbf16>, vector<16x16xf32> -> vector<16x16xf32>
    %284 = arith.addf %283, %137 : vector<16x16xf32>
    %cst_68 = arith.constant dense<0xFF800000> : vector<16xf32>
    %285 = vector.multi_reduction <maximumf>, %284, %cst_68 [1] : vector<16x16xf32> to vector<16xf32>
    %286 = vector.shape_cast %285 : vector<16xf32> to vector<16x1xf32>
    %287 = vector.broadcast %286 : vector<16x1xf32> to vector<16x16xf32>
    %288 = arith.subf %284, %287 : vector<16x16xf32>
    %289 = math.exp %288 : vector<16x16xf32>
    %cst_69 = arith.constant dense<0.000000e+00> : vector<16xf32>
    %290 = vector.multi_reduction <add>, %289, %cst_69 [1] : vector<16x16xf32> to vector<16xf32>
    %291 = vector.shape_cast %290 : vector<16xf32> to vector<16x1xf32>
    %292 = tpu.reciprocal %291 {approx = true} : vector<16x1xf32> -> vector<16x1xf32>
    %293 = vector.broadcast %292 : vector<16x1xf32> to vector<16x16xf32>
    %294 = arith.mulf %289, %293 : vector<16x16xf32>
    %295 = arith.truncf %294 : vector<16x16xf32> to vector<16x16xbf16>
    %cst_70 = arith.constant dense<0.000000e+00> : vector<16x32xf32>
    %296 = tpu.matmul %295, %282, %cst_70 {dimension_numbers = #tpu.dot_dimension_numbers<[1], [0], [0], [1], [0, 0, 1, 1], [], []>} : vector<16x16xbf16>, vector<16x32xbf16>, vector<16x32xf32> -> vector<16x32xf32>
    %297 = arith.addf %278, %296 : vector<16x32xf32>
    %cst_71 = arith.constant 0.000000e+00 : f32
    %298 = vector.broadcast %cst_71 : f32 to vector<16x32xf32>
    %299 = arith.maximumf %297, %298 : vector<16x32xf32>
    %300 = arith.addf %299, %241 : vector<16x32xf32>
    %301 = vector.extract_strided_slice %9 {offsets = [1, 0], sizes = [1, 32], strides = [1, 1]} : vector<3x32xf32> to vector<1x32xf32>
    %302 = vector.shape_cast %301 : vector<1x32xf32> to vector<32xf32>
    %303 = vector.extract_strided_slice %10 {offsets = [1, 0], sizes = [1, 32], strides = [1, 1]} : vector<3x32xf32> to vector<1x32xf32>
    %304 = vector.shape_cast %303 : vector<1x32xf32> to vector<32xf32>
    %cst_72 = arith.constant dense<0.000000e+00> : vector<16xf32>
    %305 = vector.multi_reduction <add>, %300, %cst_72 [1] : vector<16x32xf32> to vector<16xf32>
    %306 = vector.shape_cast %305 : vector<16xf32> to vector<16x1xf32>
    %cst_73 = arith.constant 3.200000e+01 : f32
    %307 = vector.broadcast %cst_73 : f32 to vector<16x1xf32>
    %308 = arith.divf %306, %307 : vector<16x1xf32>
    %309 = vector.broadcast %308 : vector<16x1xf32> to vector<16x32xf32>
    %310 = arith.subf %300, %309 : vector<16x32xf32>
    %311 = arith.mulf %310, %310 : vector<16x32xf32>
    %cst_74 = arith.constant dense<0.000000e+00> : vector<16xf32>
    %312 = vector.multi_reduction <add>, %311, %cst_74 [1] : vector<16x32xf32> to vector<16xf32>
    %313 = vector.shape_cast %312 : vector<16xf32> to vector<16x1xf32>
    %cst_75 = arith.constant 3.200000e+01 : f32
    %314 = vector.broadcast %cst_75 : f32 to vector<16x1xf32>
    %315 = arith.divf %313, %314 : vector<16x1xf32>
    %316 = vector.broadcast %308 : vector<16x1xf32> to vector<16x32xf32>
    %317 = arith.subf %300, %316 : vector<16x32xf32>
    %cst_76 = arith.constant 9.99999974E-6 : f32
    %318 = vector.broadcast %cst_76 : f32 to vector<16x1xf32>
    %319 = arith.addf %315, %318 : vector<16x1xf32>
    %320 = math.sqrt %319 : vector<16x1xf32>
    %321 = vector.broadcast %320 : vector<16x1xf32> to vector<16x32xf32>
    %322 = arith.divf %317, %321 : vector<16x32xf32>
    %323 = vector.shape_cast %302 : vector<32xf32> to vector<1x32xf32>
    %324 = vector.broadcast %323 : vector<1x32xf32> to vector<16x32xf32>
    %325 = arith.mulf %324, %322 : vector<16x32xf32>
    %326 = vector.shape_cast %304 : vector<32xf32> to vector<1x32xf32>
    %327 = vector.broadcast %326 : vector<1x32xf32> to vector<16x32xf32>
    %328 = arith.addf %325, %327 : vector<16x32xf32>
    %329 = arith.truncf %328 : vector<16x32xf32> to vector<16x32xbf16>
    %330 = vector.extract_strided_slice %7 {offsets = [2, 0, 0], sizes = [1, 32, 96], strides = [1, 1, 1]} : vector<3x32x96xbf16> to vector<1x32x96xbf16>
    %331 = vector.shape_cast %330 : vector<1x32x96xbf16> to vector<32x96xbf16>
    %cst_77 = arith.constant dense<0.000000e+00> : vector<16x96xf32>
    %332 = tpu.matmul %329, %331, %cst_77 {dimension_numbers = #tpu.dot_dimension_numbers<[1], [0], [0], [1], [0, 0, 1, 1], [], []>} : vector<16x32xbf16>, vector<32x96xbf16>, vector<16x96xf32> -> vector<16x96xf32>
    %333 = vector.extract_strided_slice %8 {offsets = [2, 0], sizes = [1, 96], strides = [1, 1]} : vector<3x96xf32> to vector<1x96xf32>
    %334 = vector.shape_cast %333 : vector<1x96xf32> to vector<96xf32>
    %335 = vector.shape_cast %334 : vector<96xf32> to vector<1x96xf32>
    %336 = vector.broadcast %335 : vector<1x96xf32> to vector<16x96xf32>
    %337 = arith.addf %332, %336 : vector<16x96xf32>
    %338 = vector.extract_strided_slice %337 {offsets = [0, 0], sizes = [16, 32], strides = [1, 1]} : vector<16x96xf32> to vector<16x32xf32>
    %cst_78 = arith.constant 2.500000e-01 : f32
    %339 = vector.broadcast %cst_78 : f32 to vector<16x32xf32>
    %340 = arith.mulf %338, %339 : vector<16x32xf32>
    %341 = arith.truncf %340 : vector<16x32xf32> to vector<16x32xbf16>
    %342 = vector.extract_strided_slice %337 {offsets = [0, 32], sizes = [16, 32], strides = [1, 1]} : vector<16x96xf32> to vector<16x32xf32>
    %343 = arith.truncf %342 : vector<16x32xf32> to vector<16x32xbf16>
    %344 = vector.extract_strided_slice %337 {offsets = [0, 64], sizes = [16, 32], strides = [1, 1]} : vector<16x96xf32> to vector<16x32xf32>
    %345 = arith.truncf %344 : vector<16x32xf32> to vector<16x32xbf16>
    %cst_79 = arith.constant 0.000000e+00 : f32
    %346 = vector.broadcast %cst_79 : f32 to vector<16x32xf32>
    %347 = vector.broadcast %146 : vector<1x32xbf16> to vector<16x32xbf16>
    %348 = arith.mulf %343, %347 : vector<16x32xbf16>
    %349 = vector.broadcast %146 : vector<1x32xbf16> to vector<16x32xbf16>
    %350 = arith.mulf %345, %349 : vector<16x32xbf16>
    %cst_80 = arith.constant dense<0.000000e+00> : vector<16x16xf32>
    %351 = tpu.matmul %341, %348, %cst_80 {dimension_numbers = #tpu.dot_dimension_numbers<[1], [1], [0], [0], [0, 0, 1, 0], [], []>} : vector<16x32xbf16>, vector<16x32xbf16>, vector<16x16xf32> -> vector<16x16xf32>
    %352 = arith.addf %351, %137 : vector<16x16xf32>
    %cst_81 = arith.constant dense<0xFF800000> : vector<16xf32>
    %353 = vector.multi_reduction <maximumf>, %352, %cst_81 [1] : vector<16x16xf32> to vector<16xf32>
    %354 = vector.shape_cast %353 : vector<16xf32> to vector<16x1xf32>
    %355 = vector.broadcast %354 : vector<16x1xf32> to vector<16x16xf32>
    %356 = arith.subf %352, %355 : vector<16x16xf32>
    %357 = math.exp %356 : vector<16x16xf32>
    %cst_82 = arith.constant dense<0.000000e+00> : vector<16xf32>
    %358 = vector.multi_reduction <add>, %357, %cst_82 [1] : vector<16x16xf32> to vector<16xf32>
    %359 = vector.shape_cast %358 : vector<16xf32> to vector<16x1xf32>
    %360 = tpu.reciprocal %359 {approx = true} : vector<16x1xf32> -> vector<16x1xf32>
    %361 = vector.broadcast %360 : vector<16x1xf32> to vector<16x16xf32>
    %362 = arith.mulf %357, %361 : vector<16x16xf32>
    %363 = arith.truncf %362 : vector<16x16xf32> to vector<16x16xbf16>
    %cst_83 = arith.constant dense<0.000000e+00> : vector<16x32xf32>
    %364 = tpu.matmul %363, %350, %cst_83 {dimension_numbers = #tpu.dot_dimension_numbers<[1], [0], [0], [1], [0, 0, 1, 1], [], []>} : vector<16x16xbf16>, vector<16x32xbf16>, vector<16x32xf32> -> vector<16x32xf32>
    %365 = arith.addf %346, %364 : vector<16x32xf32>
    %366 = vector.broadcast %154 : vector<1x32xbf16> to vector<16x32xbf16>
    %367 = arith.mulf %343, %366 : vector<16x32xbf16>
    %368 = vector.broadcast %154 : vector<1x32xbf16> to vector<16x32xbf16>
    %369 = arith.mulf %345, %368 : vector<16x32xbf16>
    %cst_84 = arith.constant dense<0.000000e+00> : vector<16x16xf32>
    %370 = tpu.matmul %341, %367, %cst_84 {dimension_numbers = #tpu.dot_dimension_numbers<[1], [1], [0], [0], [0, 0, 1, 0], [], []>} : vector<16x32xbf16>, vector<16x32xbf16>, vector<16x16xf32> -> vector<16x16xf32>
    %371 = arith.addf %370, %137 : vector<16x16xf32>
    %cst_85 = arith.constant dense<0xFF800000> : vector<16xf32>
    %372 = vector.multi_reduction <maximumf>, %371, %cst_85 [1] : vector<16x16xf32> to vector<16xf32>
    %373 = vector.shape_cast %372 : vector<16xf32> to vector<16x1xf32>
    %374 = vector.broadcast %373 : vector<16x1xf32> to vector<16x16xf32>
    %375 = arith.subf %371, %374 : vector<16x16xf32>
    %376 = math.exp %375 : vector<16x16xf32>
    %cst_86 = arith.constant dense<0.000000e+00> : vector<16xf32>
    %377 = vector.multi_reduction <add>, %376, %cst_86 [1] : vector<16x16xf32> to vector<16xf32>
    %378 = vector.shape_cast %377 : vector<16xf32> to vector<16x1xf32>
    %379 = tpu.reciprocal %378 {approx = true} : vector<16x1xf32> -> vector<16x1xf32>
    %380 = vector.broadcast %379 : vector<16x1xf32> to vector<16x16xf32>
    %381 = arith.mulf %376, %380 : vector<16x16xf32>
    %382 = arith.truncf %381 : vector<16x16xf32> to vector<16x16xbf16>
    %cst_87 = arith.constant dense<0.000000e+00> : vector<16x32xf32>
    %383 = tpu.matmul %382, %369, %cst_87 {dimension_numbers = #tpu.dot_dimension_numbers<[1], [0], [0], [1], [0, 0, 1, 1], [], []>} : vector<16x16xbf16>, vector<16x32xbf16>, vector<16x32xf32> -> vector<16x32xf32>
    %384 = arith.addf %365, %383 : vector<16x32xf32>
    %cst_88 = arith.constant 0.000000e+00 : f32
    %385 = vector.broadcast %cst_88 : f32 to vector<16x32xf32>
    %386 = arith.maximumf %384, %385 : vector<16x32xf32>
    %387 = arith.addf %386, %328 : vector<16x32xf32>
    %388 = vector.extract_strided_slice %9 {offsets = [2, 0], sizes = [1, 32], strides = [1, 1]} : vector<3x32xf32> to vector<1x32xf32>
    %389 = vector.shape_cast %388 : vector<1x32xf32> to vector<32xf32>
    %390 = vector.extract_strided_slice %10 {offsets = [2, 0], sizes = [1, 32], strides = [1, 1]} : vector<3x32xf32> to vector<1x32xf32>
    %391 = vector.shape_cast %390 : vector<1x32xf32> to vector<32xf32>
    %cst_89 = arith.constant dense<0.000000e+00> : vector<16xf32>
    %392 = vector.multi_reduction <add>, %387, %cst_89 [1] : vector<16x32xf32> to vector<16xf32>
    %393 = vector.shape_cast %392 : vector<16xf32> to vector<16x1xf32>
    %cst_90 = arith.constant 3.200000e+01 : f32
    %394 = vector.broadcast %cst_90 : f32 to vector<16x1xf32>
    %395 = arith.divf %393, %394 : vector<16x1xf32>
    %396 = vector.broadcast %395 : vector<16x1xf32> to vector<16x32xf32>
    %397 = arith.subf %387, %396 : vector<16x32xf32>
    %398 = arith.mulf %397, %397 : vector<16x32xf32>
    %cst_91 = arith.constant dense<0.000000e+00> : vector<16xf32>
    %399 = vector.multi_reduction <add>, %398, %cst_91 [1] : vector<16x32xf32> to vector<16xf32>
    %400 = vector.shape_cast %399 : vector<16xf32> to vector<16x1xf32>
    %cst_92 = arith.constant 3.200000e+01 : f32
    %401 = vector.broadcast %cst_92 : f32 to vector<16x1xf32>
    %402 = arith.divf %400, %401 : vector<16x1xf32>
    %403 = vector.broadcast %395 : vector<16x1xf32> to vector<16x32xf32>
    %404 = arith.subf %387, %403 : vector<16x32xf32>
    %cst_93 = arith.constant 9.99999974E-6 : f32
    %405 = vector.broadcast %cst_93 : f32 to vector<16x1xf32>
    %406 = arith.addf %402, %405 : vector<16x1xf32>
    %407 = math.sqrt %406 : vector<16x1xf32>
    %408 = vector.broadcast %407 : vector<16x1xf32> to vector<16x32xf32>
    %409 = arith.divf %404, %408 : vector<16x32xf32>
    %410 = vector.shape_cast %389 : vector<32xf32> to vector<1x32xf32>
    %411 = vector.broadcast %410 : vector<1x32xf32> to vector<16x32xf32>
    %412 = arith.mulf %411, %409 : vector<16x32xf32>
    %413 = vector.shape_cast %391 : vector<32xf32> to vector<1x32xf32>
    %414 = vector.broadcast %413 : vector<1x32xf32> to vector<16x32xf32>
    %415 = arith.addf %412, %414 : vector<16x32xf32>
    %416 = vector.shape_cast %415 : vector<16x32xf32> to vector<2x8x32xf32>
    %c0_94 = arith.constant 0 : index
    %c0_95 = arith.constant 0 : index
    %c0_96 = arith.constant 0 : index
    %417 = vector.load %arg11[%c0_94, %c0_95, %c0_96] : memref<2x8x32xf32, #tpu.memory_space<vmem>>, vector<2x8x32xf32>
    tpu.vector_store %arg11[%c0_94, %c0_95, %c0_96], %416 {strides = array<i32>} : memref<2x8x32xf32, #tpu.memory_space<vmem>>, vector<2x8x32xf32>,
    return
  }
  func.func @transform_0(%arg0: i32, %arg1: memref<2xi32, #tpu.memory_space<smem>>) -> (i32, i32, i32) {
    %c0_i32 = arith.constant 0 : i32
    %c0_i32_0 = arith.constant 0 : i32
    %c0_i32_1 = arith.constant 0 : i32
    return %arg0, %c0_i32, %c0_i32_0 : i32, i32, i32
  }
  func.func @transform_1(%arg0: i32, %arg1: memref<2xi32, #tpu.memory_space<smem>>) -> (i32, i32, i32) {
    %c0_i32 = arith.constant 0 : i32
    %c0_i32_0 = arith.constant 0 : i32
    %c0_i32_1 = arith.constant 0 : i32
    %c0_i32_2 = arith.constant 0 : i32
    return %c0_i32, %c0_i32_0, %c0_i32_1 : i32, i32, i32
  }
  func.func @transform_2(%arg0: i32, %arg1: memref<2xi32, #tpu.memory_space<smem>>) -> (i32, i32) {
    %c0_i32 = arith.constant 0 : i32
    %c0_i32_0 = arith.constant 0 : i32
    %c0_i32_1 = arith.constant 0 : i32
    return %c0_i32, %c0_i32_0 : i32, i32
  }
  func.func @transform_3(%arg0: i32, %arg1: memref<2xi32, #tpu.memory_space<smem>>) -> (i32, i32) {
    %c0_i32 = arith.constant 0 : i32
    %c0_i32_0 = arith.constant 0 : i32
    %c0_i32_1 = arith.constant 0 : i32
    return %c0_i32, %c0_i32_0 : i32, i32
  }
  func.func @transform_4(%arg0: i32, %arg1: memref<2xi32, #tpu.memory_space<smem>>) -> (i32, i32) {
    %c0_i32 = arith.constant 0 : i32
    %c0_i32_0 = arith.constant 0 : i32
    %c0_i32_1 = arith.constant 0 : i32
    return %c0_i32, %c0_i32_0 : i32, i32
  }
  func.func @transform_5(%arg0: i32, %arg1: memref<2xi32, #tpu.memory_space<smem>>) -> (i32, i32, i32) {
    %c0_i32 = arith.constant 0 : i32
    %c0_i32_0 = arith.constant 0 : i32
    %c0_i32_1 = arith.constant 0 : i32
    %c0_i32_2 = arith.constant 0 : i32
    return %c0_i32, %c0_i32_0, %c0_i32_1 : i32, i32, i32
  }
  func.func @transform_6(%arg0: i32, %arg1: memref<2xi32, #tpu.memory_space<smem>>) -> (i32, i32) {
    %c0_i32 = arith.constant 0 : i32
    %c0_i32_0 = arith.constant 0 : i32
    %c0_i32_1 = arith.constant 0 : i32
    return %c0_i32, %c0_i32_0 : i32, i32
  }
  func.func @transform_7(%arg0: i32, %arg1: memref<2xi32, #tpu.memory_space<smem>>) -> (i32, i32) {
    %c0_i32 = arith.constant 0 : i32
    %c0_i32_0 = arith.constant 0 : i32
    %c0_i32_1 = arith.constant 0 : i32
    return %c0_i32, %c0_i32_0 : i32, i32
  }
  func.func @transform_8(%arg0: i32, %arg1: memref<2xi32, #tpu.memory_space<smem>>) -> (i32, i32) {
    %c0_i32 = arith.constant 0 : i32
    %c0_i32_0 = arith.constant 0 : i32
    %c0_i32_1 = arith.constant 0 : i32
    return %c0_i32, %c0_i32_0 : i32, i32
  }
  func.func @transform_9(%arg0: i32, %arg1: memref<2xi32, #tpu.memory_space<smem>>) -> (i32, i32, i32) {
    %c0_i32 = arith.constant 0 : i32
    %c0_i32_0 = arith.constant 0 : i32
    %c0_i32_1 = arith.constant 0 : i32
    return %arg0, %c0_i32, %c0_i32_0 : i32, i32, i32
  }
}

</mosaic_0001>

<bundles_post_ra>
// kernel: tpu_custom_call.1
= control target key start
LH: loop header
LB: loop body
LE: loop exit
PB: predicated region body
PF: predicated region fallthrough
CT: control target
= control target key end

     0   :  { %s2513_s0 = inlined_call_operand.hbm [shape: s32[2], index: 0, kind: input, shape index: {}]   ;;  %s2514_s1 = inlined_call_operand.hbm [shape: bf16[2,8,32], index: 1, kind: input, shape index: {}]   ;;  %s2515_s2 = inlined_call_operand.hbm [shape: bf16[2,32,32], index: 2, kind: input, shape index: {}]   ;;  %s2516_s3 = inlined_call_operand.vmem [shape: f32[2,32], index: 3, kind: input, shape index: {}]   ;;  %s2517_s4 = inlined_call_operand.hbm [shape: f32[2,32], index: 4, kind: input, shape index: {}]   ;;  %s2518_s5 = inlined_call_operand.vmem [shape: f32[2,32], index: 5, kind: input, shape index: {}]   ;;  %s2519_s6 = inlined_call_operand.hbm [shape: bf16[3,32,96], index: 6, kind: input, shape index: {}]   ;;  %s2520_s7 = inlined_call_operand.vmem [shape: f32[3,96], index: 7, kind: input, shape index: {}]   ;;  %s2521_s8 = inlined_call_operand.vmem [shape: f32[3,32], index: 8, kind: input, shape index: {}]   ;;  %s2522_s9 = inlined_call_operand.vmem [shape: f32[3,32], index: 9, kind: input, shape index: {}]   ;;  %s2523_s10 = inlined_call_operand.hbm [shape: f32[2,8,32], index: 10, kind: output, shape index: {}]  }
   0x1   :  { %s1892_s15 = scalar_lea.hbm %s2513_s0, 16 }
   0x2   :  { %p1893_p0 = scmp.ne.s32.totalorder %s2513_s0, %s1892_s15  ;;  %p1896_p1 = scmp.lt.u32.totalorder %s1892_s15, %s2513_s0 }
   0x4   :  { %p1898_p2 = pnand %p1896_p1, %p1893_p0 }
   0x6   :  { %1901 = shalt.err (!%p1898_p2)  }
   0x7   :  { %s2022_s20 = smov [#allocation3]  }
   0x8   :  { %16 = dma.hbm_to_smem %s2513_s0, 16, %s2022_s20, [#allocation2] }
   0x9   :  { %2012 = dma.done.wait [#allocation2], 16 }
   0xa   :  { %2013 = vsyncadd [#allocation2], 4294967280 }
   0xb   :  { %18 = sfence }
   0xc   :  { %19 = vsyncpa [#allocation5], 0 }
   0xd   :  { %20 = vsyncpa [#allocation8], 0 }
   0xe   :  { %21 = vsyncpa [#allocation11], 0 }
   0xf   :  { %22 = vsyncpa [#allocation6], 0  ;;  %s2023_s23 = smov [#allocation7]   ;;  %s2024_s25 = smov [#allocation4]  }
  0x10   :  { %s40_s24 = sshll.u32 %s2023_s23, 4  ;;  %s28_s26 = sshll.u32 %s2024_s25, 4  ;;  %s41_s24 = int_to_ptr.vmem [resolvable:$true] %s40_s24  ;;  %s2105_s26 = int_to_ptr.vmem [resolvable:$true] %s28_s26 }
  0x11   :  { %s1902_s29 = scalar_lea.hbm %s2515_s2, 512 }
  0x12   :  { %p1903_p3 = scmp.ne.s32.totalorder %s2515_s2, %s1902_s29  ;;  %p1906_p4 = scmp.lt.u32.totalorder %s1902_s29, %s2515_s2 }
  0x14   :  { %p1908_p5 = pnand %p1906_p4, %p1903_p3 }
  0x16   :  { %1911 = shalt.err (!%p1908_p5)
}
  0x17   :  { %s1912_s13 = scalar_lea.vmem %s41_s24, 512  ;;  %p1917_p7 = scmp.lt.s32.totalorder %s41_s24, %s41_s24 }
  0x18   :  { %p1913_p6 = scmp.ne.s32.totalorder %s41_s24, %s1912_s13  ;;  %p1918_p8 = scmp.lt.s32.totalorder %s1912_s13, %s1912_s13 }
  0x1a   :  { %p1919_p9 = por %p1918_p8, %p1917_p7 }
  0x1c   :  { %p1920_p10 = pnand %p1919_p9, %p1913_p6 }
  0x1e   :  { %1923 = shalt.err (!%p1920_p10)
}
  0x1f   :  { %s2025_s14 = smov 64   ;;  %s2026_s15 = smov 4  }
  0x20   :  { %46 = dma.hbm_to_vmem [thread:$0]  %s2515_s2, 512, %s41_s24, [#allocation8], %s2025_s14, %s2025_s14, %s2026_s15  }
  0x21   :  { %s1924_s20 = scalar_lea.hbm %s2514_s1, 128 }
  0x22   :  { %p1925_p11 = scmp.ne.s32.totalorder %s2514_s1, %s1924_s20  ;;  %p1928_p12 = scmp.lt.u32.totalorder %s1924_s20, %s2514_s1 }
  0x24   :  { %p1930_p13 = pnand %p1928_p12, %p1925_p11 }
  0x26   :  { %1933 = shalt.err (!%p1930_p13)
}
  0x27   :  { %s1934_s27 = scalar_lea.vmem %s2105_s26, 128  ;;  %p1939_p1 = scmp.lt.s32.totalorder %s2105_s26, %s2105_s26 }
  0x28   :  { %p1935_p0 = scmp.ne.s32.totalorder %s2105_s26, %s1934_s27  ;;  %p1940_p2 = scmp.lt.s32.totalorder %s1934_s27, %s1934_s27 }
  0x2a   :  { %p1941_p3 = por %p1940_p2, %p1939_p1 }
  0x2c   :  { %p1942_p4 = pnand %p1941_p3, %p1935_p0 }
  0x2e   :  { %1945 = shalt.err (!%p1942_p4)
}
  0x2f   :  { %34 = dma.hbm_to_vmem [thread:$0]  %s2514_s1, 128, %s2105_s26, [#allocation5], %s2025_s14, %s2025_s14, %s2026_s15  }
  0x30   :  { %s2027_s28 = smov [#allocation9]   ;;  %s2028_s30 = smov [#allocation10]  }
  0x31   :  { %s55_s29 = sshll.u32 %s2027_s28, 4  ;;  %s66_s0 = sshll.u32 %s2028_s30, 4  ;;  %s56_s29 = int_to_ptr.vmem [resolvable:$true] %s55_s29  ;;  %s2142_s0 = int_to_ptr.vmem [resolvable:$true] %s66_s0 }
  0x32   :  { %s1946_s13 = scalar_lea.hbm %s2517_s4, 32 }
  0x33   :  { %p1947_p5 = scmp.ne.s32.totalorder %s2517_s4, %s1946_s13  ;;  %p1950_p6 = scmp.lt.u32.totalorder %s1946_s13, %s2517_s4 }
  0x35   :  { %p1952_p7 = pnand %p1950_p6, %p1947_p5 }
  0x37   :  { %1955 = shalt.err (!%p1952_p7)
}
  0x38   :  { %s1956_s1 = scalar_lea.vmem %s56_s29, 32  ;;  %p1961_p9 = scmp.lt.s32.totalorder %s56_s29, %s56_s29 }
  0x39   :  { %p1957_p8 = scmp.ne.s32.totalorder %s56_s29, %s1956_s1  ;;  %p1962_p10 = scmp.lt.s32.totalorder %s1956_s1, %s1956_s1 }
  0x3b   :  { %p1963_p11 = por %p1962_p10, %p1961_p9 }
  0x3d   :  { %p1964_p12 = pnand %p1963_p11, %p1957_p8 }
  0x3f   :  { %1967 = shalt.err (!%p1964_p12)
}
  0x40   :  { %58 = dma.hbm_to_vmem [thread:$0]  %s2517_s4, 32, %s56_s29, [#allocation8]  }
  0x41   :  { %s1968_s23 = scalar_lea.hbm %s2519_s6, 768 }
  0x42   :  { %p1969_p13 = scmp.ne.s32.totalorder %s2519_s6, %s1968_s23  ;;  %p1972_p0 = scmp.lt.u32.totalorder %s1968_s23, %s2519_s6 }
  0x44   :  { %p1974_p1 = pnand %p1972_p0, %p1969_p13 }
  0x46   :  { %1977 = shalt.err (!%p1974_p1)
}
  0x47   :  { %s1978_s28 = scalar_lea.vmem %s2142_s0, 768  ;;  %p1983_p3 = scmp.lt.s32.totalorder %s2142_s0, %s2142_s0 }
  0x48   :  { %p1979_p2 = scmp.ne.s32.totalorder %s2142_s0, %s1978_s28  ;;  %p1984_p4 = scmp.lt.s32.totalorder %s1978_s28, %s1978_s28 }
  0x4a   :  { %p1985_p5 = por %p1984_p4, %p1983_p3 }
  0x4c   :  { %p1986_p6 = pnand %p1985_p5, %p1979_p2 }
  0x4e   :  { %1989 = shalt.err (!%p1986_p6)
}
  0x4f   :  { %72 = dma.hbm_to_vmem [thread:$0]  %s2519_s6, 768, %s2142_s0, [#allocation11], %s2025_s14, %s2025_s14, %s2026_s15  }
  0x50   :  { %2014 = dma.done.wait [#allocation5], 128  }
  0x51   :  { %2015 = vsyncadd [#allocation5], 4294967168 }
  0x52   :  { %2016 = dma.done.wait [#allocation8], 544  }
  0x53   :  { %2017 = vsyncadd [#allocation8], 4294966752 }
  0x54   :  { %2018 = dma.done.wait [#allocation11], 768  }
  0x55   :  { %2019 = vsyncadd [#allocation11], 4294966528  ;;  %v2029_v0 = vmov 0.0   ;;  %vm2030_vm0 = vmmov 0   ;;  %v1793_v1 = vld [vmem:[#allocation7] sm:$0xff]   ;;  %v1794_v2 = vld [vmem:[#allocation7 + $0x8] sm:$0xff]   ;;  %v121_v4 = vlaneseq }
  0x56   :  { %1647 = vmatprep.subr.bf16.mxu0 %v2029_v0  ;;  %1651 = vmatprep.mubr.msk.bf16.mxu0 %vm2030_vm0, %v2029_v0  ;;  %v1795_v3 = vld [vmem:[#allocation4] sm:$0xff]   ;;  %vm142_vm1 = vcmask 261120   ;;  %v2196_v7 = vld [vmem:[%s2516_s3] sm:$0x3]  ;;  %v2206_v45 = vld [vmem:[#allocation9] sm:$0x3] }
  0x57   :  { %1655 = vmatprep.subr.bf16.mxu1 %v2029_v0  ;;  %1659 = vmatprep.mubr.msk.bf16.mxu1 %vm2030_vm0, %v2029_v0  ;;  %v2188_v5 = vshrl.u32 %v121_v4, 7  ;;  %v1796_v27 = vld [vmem:[#allocation7 + $0x10] sm:$0xff]   ;;  %v1797_v28 = vld [vmem:[#allocation7 + $0x18] sm:$0xff]   ;;  %s1578_s12 = sld [smem:[#allocation3 + $0x1]]  ;;  %s2032_s13 = smov 96  }
  0x58   :  { %1648 = vmatpush3.bf16.msra.mxu0 %v1793_v1  ;;  %1656 = vmatpush3.bf16.msra.mxu1 %v1796_v27  ;;  %v2213_v48 = vld [vmem:[%s2518_s5] sm:$0x3]  ;;  %s2031_s5 = smov 32   ;;  %s2034_s16 = smov 8  }
  0x59   :  { %1649 = vmatprep.subr.bf16.mxu0 %v2029_v0  ;;  %v2191_v6 = vsub.s32 0, %v2188_v5  ;;  %1657 = vmatprep.subr.bf16.mxu1 %v2029_v0  ;;  %v2221_v60 = vsub.s32 1, %v2188_v5 }
  0x5b   :  { %v124_v8 = vrot.slane %v2196_v7, %v2191_v6  ;;  %v231_v47 = vrot.slane %v2206_v45, %v2191_v6  ;;  %v237_v51 = vrot.slane %v2213_v48, %v2191_v6  ;;  %v246_v61 = vrot.slane %v2196_v7, %v2221_v60 }
  0x5c   :  { %1650 = vmatpush3.bf16.msra.mxu0 %v1794_v2  ;;  %1658 = vmatpush3.bf16.msra.mxu1 %v1797_v28 }
  0x5d   :  { %1663 = vmatprep.subr.bf16.mxu0 %v2029_v0  ;;  %1671 = vmatprep.subr.bf16.mxu1 %v2029_v0 }
  0x5f   :  { %1652 = vmatmul.mubr.msk.bf16.vlgmr.msra.gmra.mrb[0].mxu0 %vm142_vm1, %v1795_v3 }
  0x60   :  { %1667 = vmatprep.mubr.msk.bf16.mxu0 %vm2030_vm0, %v2029_v0 }
 0x132   :  { %v180_v9 = vpop.f32.mrb[0].mxu0 }
 0x133   :  { %v181_v10 = vadd.f32 %v180_v9, %v124_v8  ;;  %v1653_v11 = vpop.f32.mrb[1].mxu0 }
 0x134   :  { %v183_v12 = vpop.f32.mrb[2].mxu0 }
 0x135   :  { %v184_v13 = vadd.f32 %v183_v12, %v124_v8  ;;  %v1654_v14 = vpop.f32.mrb[3].mxu0  ;;  %v187_v15 = vsel %vm142_vm1, %v181_v10, 0.0 }
 0x136   :  { %188 = vadd.xlane.f32.xlu0 %v187_v15 }
 0x137   :  { %v190_v16 = vsel %vm142_vm1, %v184_v13, 0.0 }
 0x13a   :  { %191 = vadd.xlane.f32.xlu0 %v190_v16 }
 0x1c3   :  { %v189_v17 = vpop.xlane.xlu0 %188 }
 0x1c4   :  { %v194_v18 = vmul.f32 0.03125, %v189_v17 }
 0x1c6   :  { %v196_v19 = vsub.f32 %v181_v10, %v194_v18 }
 0x1c7   :  { %v192_v20 = vpop.xlane.xlu0 %191 }
 0x1c8   :  { %v195_v21 = vmul.f32 0.03125, %v192_v20  ;;  %v198_v22 = vmul.f32 %v196_v19, %v196_v19  ;;  %v1798_v20 = vld [vmem:[#allocation10] sm:$0xff]  }
 0x1c9   :  { %1664 = vmatpush3.bf16.msra.mxu0 %v1798_v20 }
 0x1ca   :  { %v197_v23 = vsub.f32 %v184_v13, %v195_v21  ;;  %v200_v24 = vsel %vm142_vm1, %v198_v22, 0.0  ;;  %v1799_v21 = vld [vmem:[#allocation10 + $0x8] sm:$0xff]   ;;  %1665 = vmatprep.subr.bf16.mxu0 %v2029_v0  ;;  %v2232_v22 = vand.u32 127, %v121_v4 }
 0x1cb   :  { %201 = vadd.xlane.f32.xlu1 %v200_v24 }
 0x1cc   :  { %v199_v25 = vmul.f32 %v197_v23, %v197_v23  ;;  %vm435_vm6 = vcmp.ge.s32.totalorder %v2232_v22, 16  ;;  %vm436_vm7 = vcmp.lt.s32.totalorder %v2232_v22, 32  ;;  %vm430_vm8 = vcmp.lt.s32.totalorder %v2232_v22, 16 }
 0x1cd   :  { %1666 = vmatpush3.bf16.msra.mxu0 %v1799_v21  ;;  %vm437_vm9 = vmand %vm435_vm6, %vm436_vm7  ;;  %vm565_vm7 = vcmask 130048  }
 0x1ce   :  { %v203_v26 = vsel %vm142_vm1, %v199_v25, 0.0  ;;  %1677 = vmatprep.subr.bf16.mxu0 %v2029_v0  ;;  %v1586_v24 = vsel %vm437_vm9, 1.0, %v2029_v0 }
 0x1cf   :  { %204 = vadd.xlane.f32.xlu1 %v203_v26  ;;  %v2241_v26 = vpack.c.bf16 %v1586_v24, %v1586_v24 }
 0x258   :  { %v202_v29 = vpop.xlane.xlu1 %201 }
 0x259   :  { %v206_v30 = vmul.f32 0.03125, %v202_v29 }
 0x25b   :  { %v208_v31 = vadd.f32 1e-05, %v206_v30 }
 0x25c   :  { %v205_v32 = vpop.xlane.xlu1 %204 }
 0x25d   :  { %1804 = vrsqrt.f32 %v208_v31  ;;  %v207_v33 = vmul.f32 0.03125, %v205_v32  ;;  %vm212_vm2 = vcmp.eq.f32.partialorder %v208_v31, inf  ;;  %v215_v37 = vand.u32 2147483648, %v208_v31 }
 0x25e   :  { %vm214_vm3 = vcmp.eq.f32.partialorder %v208_v31, 0.0 }
 0x25f   :  { %v209_v34 = vadd.f32 1e-05, %v207_v33 }
 0x261   :  { %1806 = vrsqrt.f32 %v209_v34  ;;  %vm219_vm4 = vcmp.eq.f32.partialorder %v209_v34, inf  ;;  %v222_v42 = vand.u32 2147483648, %v209_v34  ;;  %vm221_vm5 = vcmp.eq.f32.partialorder %v209_v34, 0.0 }
 0x267   :  { %v1805_v35 = vpop.eup %1804 }
 0x268   :  { %v211_v36 = vmul.f32 %v1805_v35, %v208_v31 }
 0x26a   :  { %v213_v38 = vsel %vm212_vm2, %v208_v31, %v211_v36 }
 0x26b   :  { %v216_v39 = vsel %vm214_vm3, %v215_v37, %v213_v38  ;;  %v1807_v40 = vpop.eup %1806 }
 0x26c   :  { %1808 = vrcp.f32 %v216_v39  ;;  %v218_v41 = vmul.f32 %v1807_v40, %v209_v34 }
 0x26e   :  { %v220_v43 = vsel %vm219_vm4, %v209_v34, %v218_v41  ;;  %vm382_vm4 = vcmask 64512  }
 0x26f   :  { %v223_v44 = vsel %vm221_vm5, %v222_v42, %v220_v43  ;;  %v346_v42 = vrot.slane %v2206_v45, %v2221_v60 }
 0x270   :  { %1810 = vrcp.f32 %v223_v44  ;;  %v352_v44 = vrot.slane %v2213_v48, %v2221_v60  ;;  %v2265_v48 = vld [vmem:[%s2520_s7] sm:$0x7]  ;;  %s2277_s7 = sld [smem:[#allocation3]] }
 0x276   :  { %v1809_v46 = vpop.eup %1808 }
 0x277   :  { %v225_v49 = vmul.f32 %v1809_v46, %v196_v19 }
 0x279   :  { %v232_v50 = vmul.f32 %v231_v47, %v225_v49 }
 0x27a   :  { %v1811_v52 = vpop.eup %1810 }
 0x27b   :  { %v227_v53 = vmul.f32 %v1811_v52, %v197_v23  ;;  %v238_v55 = vadd.f32 %v237_v51, %v232_v50  ;;  %v1585_v23 = vsel %vm430_vm8, 1.0, %v2029_v0 }
 0x27c   :  { %v2239_v25 = vpack.c.bf16 %v1585_v23, %v1585_v23 }
 0x27d   :  { %v233_v54 = vmul.f32 %v231_v47, %v227_v53  ;;  %v240_v57 = vmax.f32 %v238_v55, 0.0 }
 0x27f   :  { %v239_v56 = vadd.f32 %v237_v51, %v233_v54 }
 0x281   :  { %v241_v58 = vmax.f32 %v239_v56, 0.0  ;;  %v445_v56 = vrot.slane %v2265_v48, %v2191_v6 }
 0x283   :  { %v242_v59 = vpack.c.bf16 %v241_v58, %v240_v57 }
 0x285   :  { %1660 = vmatmul.mubr.msk.bf16.vlgmr.msra.gmra.mrb[0].mxu1 %vm142_vm1, %v242_v59 }
 0x286   :  { %1673 = vmatprep.mubr.msk.bf16.mxu1 %vm2030_vm0, %v2029_v0 }
 0x358   :  { %v296_v62 = vpop.f32.mrb[0].mxu1 }
 0x359   :  { %v297_v63 = vadd.f32 %v296_v62, %v246_v61  ;;  %v1661_v1 = vpop.f32.mrb[1].mxu1 }
 0x35a   :  { %v299_v2 = vpop.f32.mrb[2].mxu1 }
 0x35b   :  { %v300_v3 = vadd.f32 %v299_v2, %v246_v61  ;;  %v1662_v8 = vpop.f32.mrb[3].mxu1  ;;  %v303_v9 = vsel %vm142_vm1, %v297_v63, 0.0 }
 0x35c   :  { %304 = vadd.xlane.f32.xlu0 %v303_v9 }
 0x35d   :  { %v306_v10 = vsel %vm142_vm1, %v300_v3, 0.0 }
 0x35e   :  { %307 = vadd.xlane.f32.xlu1 %v306_v10 }
 0x3e9   :  { %v305_v11 = vpop.xlane.xlu0 %304 }
 0x3ea   :  { %v309_v12 = vmul.f32 0.03125, %v305_v11 }
 0x3eb   :  { %v308_v13 = vpop.xlane.xlu1 %307 }
 0x3ec   :  { %v311_v14 = vsub.f32 %v297_v63, %v309_v12  ;;  %v310_v15 = vmul.f32 0.03125, %v308_v13  ;;  %v2033_v12 = vmov 0  }
 0x3ed   :  { %1787 = vset.pattern.permute.xlu0 %v2033_v12 }
 0x3ee   :  { %v312_v16 = vsub.f32 %v300_v3, %v310_v15  ;;  %v313_v17 = vmul.f32 %v311_v14, %v311_v14  ;;  %v371_v15 = vstv %s1578_s12 }
 0x3ef   :  { %vm372_vm15 = vcmp.lt.s32.totalorder %v2188_v5, %v371_v15  ;;  %vm375_vm2 = vcmp.lt.s32.totalorder %v2232_v22, %v371_v15 }
 0x3f0   :  { %v315_v7 = vsel %vm142_vm1, %v313_v17, 0.0  ;;  %v314_v18 = vmul.f32 %v312_v16, %v312_v16  ;;  %v1579_v17 = vsel %vm372_vm15, 1.0, %v2029_v0 }
 0x3f1   :  { %316 = vadd.xlane.f32.xlu0 %v315_v7  ;;  %v1580_v7 = vsel %vm375_vm2, 1.0, %v2029_v0 }
 0x3f2   :  { %v318_v19 = vsel %vm142_vm1, %v314_v18, 0.0 }
 0x3f3   :  { %319 = vadd.xlane.f32.xlu1 %v318_v19 }
 0x404   :  { %507 = vrot.lane.b32.xlu1 %v2239_v25, %s2031_s5 }
 0x407   :  { %590 = vrot.lane.b32.xlu0 %v2241_v26, %s2031_s5 }
 0x47e   :  { %v317_v4 = vpop.xlane.xlu0 %316 }
 0x47f   :  { %v321_v27 = vmul.f32 0.03125, %v317_v4 }
 0x480   :  { %v320_v28 = vpop.xlane.xlu1 %319 }
 0x481   :  { %v323_v29 = vadd.f32 1e-05, %v321_v27  ;;  %v322_v30 = vmul.f32 0.03125, %v320_v28 }
 0x482   :  { %v2269_v1 = vpop.permute.xlu0 %590 }
 0x483   :  { %1812 = vrsqrt.f32 %v323_v29  ;;  %v324_v31 = vadd.f32 1e-05, %v322_v30  ;;  %vm327_vm10 = vcmp.eq.f32.partialorder %v323_v29, inf  ;;  %v330_v34 = vand.u32 2147483648, %v323_v29 }
 0x484   :  { %vm329_vm11 = vcmp.eq.f32.partialorder %v323_v29, 0.0  ;;  %v2275_v11 = vpop.permute.xlu1 %507 }
 0x485   :  { %1814 = vrsqrt.f32 %v324_v31  ;;  %vm334_vm12 = vcmp.eq.f32.partialorder %v324_v31, inf  ;;  %v337_v39 = vand.u32 2147483648, %v324_v31  ;;  %vm336_vm13 = vcmp.eq.f32.partialorder %v324_v31, 0.0 }
 0x48d   :  { %v1813_v32 = vpop.eup %1812 }
 0x48e   :  { %v326_v33 = vmul.f32 %v1813_v32, %v323_v29 }
 0x48f   :  { %v1815_v35 = vpop.eup %1814 }
 0x490   :  { %v328_v36 = vsel %vm327_vm10, %v323_v29, %v326_v33  ;;  %v333_v38 = vmul.f32 %v1815_v35, %v324_v31  ;;  %v2035_v29 = vmov 1  }
 0x491   :  { %v331_v37 = vsel %vm329_vm11, %v330_v34, %v328_v36  ;;  %v400_v30 = vsel %vm382_vm4, 0, %v2035_v29 }
 0x492   :  { %1816 = vrcp.f32 %v331_v37  ;;  %v335_v40 = vsel %vm334_vm12, %v324_v31, %v333_v38  ;;  %v410_v33 = vrot.slane %v400_v30, %v2191_v6 }
 0x493   :  { %v338_v41 = vsel %vm336_vm13, %v337_v39, %v335_v40 }
 0x494   :  { %1818 = vrcp.f32 %v338_v41  ;;  %vm1581_vm5 = vcmp.eq.s32.totalorder %v410_v33, 0  ;;  %vm1582_vm6 = vcmp.eq.s32.totalorder %v410_v33, 1 }
 0x495   :  { %v1584_v39 = vsel %vm1582_vm6, 1.0, %v2029_v0 }
 0x49c   :  { %v1817_v43 = vpop.eup %1816 }
 0x49d   :  { %v340_v46 = vmul.f32 %v1817_v43, %v311_v14  ;;  %v362_v14 = vstv %s2277_s7 }
 0x49e   :  { %v1819_v47 = vpop.eup %1818  ;;  %vm363_vm14 = vcmp.lt.s32.totalorder %v2188_v5, %v362_v14  ;;  %vm366_vm3 = vcmp.lt.s32.totalorder %v2232_v22, %v362_v14  ;;  %v1583_v22 = vsel %vm1581_vm5, 1.0, %v2029_v0 }
 0x49f   :  { %v347_v49 = vmul.f32 %v346_v42, %v340_v46  ;;  %v342_v50 = vmul.f32 %v1819_v47, %v312_v16  ;;  %v1576_v16 = vsel %vm363_vm14, 1.0, %v2029_v0  ;;  %v1577_v24 = vsel %vm366_vm3, 1.0, %v2029_v0 }
 0x4a0   :  { %v1788_v18 = vpack.i.bf16 %v1579_v17, %v1576_v16  ;;  %v423_v40 = vsub.f32 1.0, %v1583_v22 }
 0x4a1   :  { %v2249_v51 = vadd.f32 %v352_v44, %v347_v49  ;;  %v348_v52 = vmul.f32 %v346_v42, %v342_v50  ;;  %v424_v42 = vsub.f32 1.0, %v1584_v39 }
 0x4a2   :  { %1789 = vperm.xlu0 %1787, %v1788_v18  }
 0x4a3   :  { %v2251_v53 = vadd.f32 %v352_v44, %v348_v52  ;;  %v355_v54 = vmax.f32 %v2249_v51, 0.0  ;;  %v425_v44 = vmul.f32 -1e+09, %v423_v40  ;;  %v426_v47 = vmul.f32 -1e+09, %v424_v42 }
 0x4a5   :  { %v356_v55 = vmax.f32 %v2251_v53, 0.0  ;;  %v1800_v53 = vld [vmem:[#allocation10 + $0x10] sm:$0xff]  }
 0x4a7   :  { %v441_v45 = vpack.c.bf16 %v356_v55, %v355_v54 }
 0x4a9   :  { %1668 = vmatmul.mubr.msk.bf16.vlgmr.msra.gmra.mrb[4].mxu0 %vm142_vm1, %v441_v45 }
 0x4aa   :  { %1679 = vmatprep.mubr.msk.bf16.mxu0 %vm2030_vm0, %v2029_v0 }
 0x521   :  { %v1790_v28 = vpop.permute.xlu0 %1789 }
 0x522   :  { %v1791_v32 = vunpack.i.l.bf16 %v1790_v28  ;;  %v1792_v34 = vunpack.i.h.bf16 %v1790_v28 }
 0x57c   :  { %v495_v57 = vpop.f32.mrb[4].mxu0 }
 0x57d   :  { %v496_v58 = vadd.f32 %v495_v57, %v445_v56  ;;  %v1669_v59 = vpop.f32.mrb[5].mxu0 }
 0x57e   :  { %v498_v61 = vpop.f32.mrb[6].mxu0 }
 0x57f   :  { %v499_v62 = vadd.f32 %v498_v61, %v445_v56  ;;  %v1670_v63 = vpop.f32.mrb[7].mxu0  ;;  %v502_v2 = vmul.f32 0.25, %v496_v58 }
 0x581   :  { %v503_v3 = vmul.f32 0.25, %v499_v62  ;;  %v2271_v8 = vpack.c.bf16 %v499_v62, %v496_v58 }
 0x583   :  { %v504_v9 = vpack.c.bf16 %v503_v3, %v502_v2  ;;  %v593_v10 = vmul.bf16 %v2269_v1, %v2271_v8  ;;  %v510_v13 = vmul.bf16 %v2275_v11, %v2271_v8 }
 0x585   :  { %599 = vrot.lane.b32.xlu1 %v593_v10, %s2032_s13 }
 0x589   :  { %516 = vrot.lane.b32.xlu1 %v510_v13, %s2032_s13 }
 0x58d   :  { %379 = vrot.lane.b32.xlu1 %v1580_v7, %s2034_s16 }
 0x5f7   :  { %v600_v19 = vpop.permute.xlu1 %599 }
 0x5f8   :  { %v602_v20 = vsel %vm142_vm1, %v600_v19, 0 }
 0x5f9   :  { %1678 = vmatpush3.bf16.xpose.msra.mxu0 %v602_v20 }
 0x5fa   :  { %1695 = vmatprep.subr.bf16.mxu0 %v2029_v0 }
 0x5fb   :  { %v517_v21 = vpop.permute.xlu1 %516 }
 0x5fc   :  { %v522_v23 = vsel %vm142_vm1, %v517_v21, 0 }
 0x5fd   :  { %1672 = vmatpush3.bf16.xpose.msra.mxu1 %v522_v23 }
 0x5fe   :  { %1683 = vmatprep.subr.bf16.mxu1 %v2029_v0 }
 0x5ff   :  { %v380_v4 = vpop.permute.xlu1 %379 }
 0x600   :  { %1680 = vmatmul.mubr.msk.bf16.vlgmr.msra.gmra.mrb[8].mxu0 %vm142_vm1, %v504_v9  ;;  %v383_v27 = vsel %vm382_vm4, %v1577_v24, %v380_v4 }
 0x601   :  { %1699 = vmatprep.mubr.msk.bf16.mxu0 %vm2030_vm0, %v2029_v0  ;;  %v397_v31 = vrot.slane %v383_v27, %v2191_v6  ;;  %1696 = vmatpush3.bf16.msra.mxu0 %v1800_v53 }
 0x602   :  { %1697 = vmatprep.subr.bf16.mxu0 %v2029_v0 }
 0x603   :  { %v398_v35 = vmul.f32 %v1791_v32, %v397_v31  ;;  %v399_v36 = vmul.f32 %v1792_v34, %v397_v31 }
 0x604   :  { %1674 = vmatmul.mubr.msk.bf16.vlgmr.msra.gmra.mrb[4].mxu1 %vm142_vm1, %v504_v9 }
 0x605   :  { %1685 = vmatprep.mubr.msk.bf16.mxu1 %vm2030_vm0, %v2029_v0  ;;  %v417_v37 = vsub.f32 1.0, %v398_v35  ;;  %v418_v38 = vsub.f32 1.0, %v399_v36 }
 0x607   :  { %v419_v41 = vmul.f32 %v1583_v22, %v417_v37  ;;  %v420_v43 = vmul.f32 %v1584_v39, %v418_v38 }
 0x609   :  { %v421_v46 = vmul.f32 -10000.0, %v419_v41  ;;  %v422_v49 = vmul.f32 -10000.0, %v420_v43 }
 0x60b   :  { %v2307_v50 = vadd.f32 %v425_v44, %v421_v46  ;;  %v2309_v52 = vadd.f32 %v426_v47, %v422_v49 }
 0x6d3   :  { %v638_v45 = vpop.f32.mrb[8].mxu0 }
 0x6d4   :  { %v639_v56 = vadd.f32 %v638_v45, %v2307_v50  ;;  %v1681_v57 = vpop.f32.mrb[9].mxu0 }
 0x6d5   :  { %v641_v58 = vpop.f32.mrb[10].mxu0 }
 0x6d6   :  { %v642_v59 = vadd.f32 %v641_v58, %v2309_v52  ;;  %v1682_v61 = vpop.f32.mrb[11].mxu0  ;;  %v645_v62 = vsel %vm565_vm7, %v639_v56, -inf }
 0x6d7   :  { %v558_v63 = vpop.f32.mrb[4].mxu1  ;;  %646 = vmax.xlane.f32.xlu1 %v645_v62 }
 0x6d8   :  { %v559_v2 = vadd.f32 %v558_v63, %v2307_v50  ;;  %v1675_v3 = vpop.f32.mrb[5].mxu1  ;;  %v648_v9 = vsel %vm565_vm7, %v642_v59, -inf }
 0x6d9   :  { %v561_v10 = vpop.f32.mrb[6].mxu1  ;;  %649 = vmax.xlane.f32.xlu0 %v648_v9 }
 0x6da   :  { %v1676_v12 = vpop.f32.mrb[7].mxu1  ;;  %v562_v13 = vadd.f32 %v561_v10, %v2309_v52  ;;  %v566_v14 = vsel %vm565_vm7, %v559_v2, -inf }
 0x6dc   :  { %v569_v15 = vsel %vm565_vm7, %v562_v13, -inf }
 0x6dd   :  { %567 = vmax.xlane.f32.xlu0 %v566_v14 }
 0x6e1   :  { %570 = vmax.xlane.f32.xlu0 %v569_v15 }
 0x6e8   :  { %594 = vrot.lane.b32.xlu1 %v2241_v26, %s2025_s14 }
 0x6f7   :  { %511 = vrot.lane.b32.xlu0 %v2239_v25, %s2025_s14 }
 0x764   :  { %v647_v16 = vpop.xlane.xlu1 %646 }
 0x765   :  { %v651_v17 = vsub.f32 %v639_v56, %v647_v16 }
 0x766   :  { %v650_v7 = vpop.xlane.xlu0 %649 }
 0x767   :  { %v653_v18 = vmul.f32 1.442695, %v651_v17  ;;  %v652_v19 = vsub.f32 %v642_v59, %v650_v7 }
 0x768   :  { %v2327_v35 = vpop.permute.xlu1 %594 }
 0x769   :  { %1820 = vpow2.f32 %v653_v18  ;;  %v655_v20 = vmul.f32 1.442695, %v652_v19  ;;  %v597_v36 = vmul.bf16 %v2327_v35, %v2271_v8 }
 0x76a   :  { %v568_v21 = vpop.xlane.xlu0 %567 }
 0x76b   :  { %1822 = vpow2.f32 %v655_v20  ;;  %v572_v23 = vsub.f32 %v559_v2, %v568_v21 }
 0x76d   :  { %v574_v24 = vmul.f32 1.442695, %v572_v23 }
 0x76e   :  { %v571_v4 = vpop.xlane.xlu0 %570 }
 0x76f   :  { %1824 = vpow2.f32 %v574_v24  ;;  %v573_v27 = vsub.f32 %v562_v13, %v571_v4 }
 0x771   :  { %v576_v28 = vmul.f32 1.442695, %v573_v27 }
 0x772   :  { %v2332_v37 = vpop.permute.xlu0 %511 }
 0x773   :  { %v1821_v29 = vpop.eup %1820  ;;  %1826 = vpow2.f32 %v576_v28  ;;  %v514_v22 = vmul.bf16 %v2332_v37, %v2271_v8 }
 0x774   :  { %v657_v26 = vsel %vm565_vm7, %v1821_v29, 0.0 }
 0x775   :  { %v1823_v25 = vpop.eup %1822  ;;  %658 = vadd.xlane.f32.xlu1 %v657_v26 }
 0x776   :  { %v660_v30 = vsel %vm565_vm7, %v1823_v25, 0.0 }
 0x777   :  { %661 = vadd.xlane.f32.xlu0 %v660_v30 }
 0x779   :  { %v1825_v31 = vpop.eup %1824 }
 0x77a   :  { %v578_v32 = vsel %vm565_vm7, %v1825_v31, 0.0 }
 0x77b   :  { %579 = vadd.xlane.f32.xlu1 %v578_v32 }
 0x77d   :  { %v1827_v33 = vpop.eup %1826 }
 0x77e   :  { %v581_v34 = vsel %vm565_vm7, %v1827_v33, 0.0 }
 0x77f   :  { %582 = vadd.xlane.f32.xlu0 %v581_v34 }
 0x78c   :  { %669 = vrot.lane.b32.xlu1 %v597_v36, %s2025_s14 }
 0x795   :  { %717 = vrot.lane.b32.xlu0 %v514_v22, %s2025_s14 }
 0x802   :  { %v659_v38 = vpop.xlane.xlu1 %658 }
 0x803   :  { %1828 = vrcp.f32 %v659_v38 }
 0x804   :  { %v662_v39 = vpop.xlane.xlu0 %661 }
 0x805   :  { %1830 = vrcp.f32 %v662_v39  ;;  %v2358_v39 = vld [vmem:[%s2521_s8] sm:$0x7]  ;;  %s2036_s8 = smov [#allocation12]  }
 0x808   :  { %v580_v40 = vpop.xlane.xlu1 %579 }
 0x80c   :  { %v670_v41 = vpop.permute.xlu1 %669  ;;  %v583_v42 = vpop.xlane.xlu0 %582 }
 0x80d   :  { %v1829_v43 = vpop.eup %1828  ;;  %1832 = vrcp.f32 %v583_v42  ;;  %1684 = vmatpush3.bf16.msra.mxu1 %v670_v41  ;;  %v811_v41 = vrot.slane %v2358_v39, %v2191_v6  ;;  %v2365_v42 = vld [vmem:[%s2522_s9] sm:$0x7]  ;;  %s1555_s9 = sshll.u32 %s2036_s8, 4  ;;  %s1556_s9 = int_to_ptr.vmem [resolvable:$true] %s1555_s9 }
 0x80e   :  { %1689 = vmatprep.subr.bf16.mxu1 %v2029_v0  ;;  %1834 = vrcp.f32 %v580_v40  ;;  %v665_v46 = vmul.f32 %v1829_v43, %v1821_v29  ;;  %p1995_p8 = scmp.lt.s32.totalorder %s1556_s9, %s1556_s9 }
 0x80f   :  { %v1831_v44 = vpop.eup %1830 }
 0x810   :  { %v666_v47 = vmul.f32 %v1831_v44, %v1823_v25  ;;  %v718_v8 = vpop.permute.xlu0 %717 }
 0x812   :  { %v667_v49 = vpack.c.bf16 %v666_v47, %v665_v46 }
 0x814   :  { %1686 = vmatmul.mubr.msk.bf16.vlgmr.msra.gmra.mrb[8].mxu1 %vm565_vm7, %v667_v49  ;;  %v817_v49 = vrot.slane %v2365_v42, %v2191_v6 }
 0x815   :  { %1690 = vmatpush3.bf16.msra.mxu1 %v718_v8  ;;  %1691 = vmatprep.mubr.msk.bf16.mxu1 %vm2030_vm0, %v2029_v0 }
 0x816   :  { %1709 = vmatprep.subr.bf16.mxu1 %v2029_v0 }
 0x817   :  { %v1833_v45 = vpop.eup %1832 }
 0x818   :  { %v1835_v56 = vpop.eup %1834  ;;  %v587_v57 = vmul.f32 %v1833_v45, %v1827_v33 }
 0x819   :  { %v586_v58 = vmul.f32 %v1835_v56, %v1825_v31 }
 0x81b   :  { %v588_v59 = vpack.c.bf16 %v587_v57, %v586_v58  ;;  %v824_v58 = vrot.slane %v2265_v48, %v2221_v60 }
 0x820   :  { %1692 = vmatmul.mubr.msk.bf16.vlgmr.msra.gmra.mrb[8].mxu1 %vm565_vm7, %v588_v59 }
 0x821   :  { %1711 = vmatprep.mubr.msk.bf16.mxu1 %vm2030_vm0, %v2029_v0 }
 0x8f3   :  { %v757_v61 = vpop.f32.mrb[8].mxu1 }
 0x8f4   :  { %v764_v62 = vmax.f32 %v757_v61, 0.0  ;;  %v1693_v63 = vpop.f32.mrb[9].mxu1 }
 0x8f5   :  { %v760_v2 = vpop.f32.mrb[10].mxu1 }
 0x8f6   :  { %v765_v3 = vmax.f32 %v760_v2, 0.0  ;;  %v1694_v9 = vpop.f32.mrb[11].mxu1  ;;  %v766_v10 = vadd.f32 %v764_v62, %v355_v54 }
 0x8f8   :  { %v768_v12 = vsel %vm142_vm1, %v766_v10, 0.0  ;;  %v767_v13 = vadd.f32 %v765_v3, %v356_v55  ;;  %v1801_v55 = vld [vmem:[#allocation10 + $0x18] sm:$0xff]  }
 0x8f9   :  { %769 = vadd.xlane.f32.xlu1 %v768_v12  ;;  %1698 = vmatpush3.bf16.msra.mxu0 %v1801_v55 }
 0x8fa   :  { %v771_v14 = vsel %vm142_vm1, %v767_v13, 0.0  ;;  %1703 = vmatprep.subr.bf16.mxu0 %v2029_v0 }
 0x8fb   :  { %772 = vadd.xlane.f32.xlu0 %v771_v14 }
 0x986   :  { %v770_v15 = vpop.xlane.xlu1 %769 }
 0x987   :  { %v774_v16 = vmul.f32 0.03125, %v770_v15 }
 0x988   :  { %v773_v17 = vpop.xlane.xlu0 %772 }
 0x989   :  { %v776_v7 = vsub.f32 %v766_v10, %v774_v16  ;;  %v775_v18 = vmul.f32 0.03125, %v773_v17 }
 0x98b   :  { %v777_v19 = vsub.f32 %v767_v13, %v775_v18  ;;  %v778_v20 = vmul.f32 %v776_v7, %v776_v7 }
 0x98d   :  { %v780_v21 = vsel %vm142_vm1, %v778_v20, 0.0  ;;  %v779_v51 = vmul.f32 %v777_v19, %v777_v19 }
 0x98e   :  { %781 = vadd.xlane.f32.xlu1 %v780_v21 }
 0x98f   :  { %v783_v54 = vsel %vm142_vm1, %v779_v51, 0.0 }
 0x990   :  { %784 = vadd.xlane.f32.xlu0 %v783_v54 }
 0xa1b   :  { %v782_v23 = vpop.xlane.xlu1 %781 }
 0xa1c   :  { %v786_v24 = vmul.f32 0.03125, %v782_v23 }
 0xa1d   :  { %v785_v4 = vpop.xlane.xlu0 %784 }
 0xa1e   :  { %v788_v27 = vadd.f32 1e-05, %v786_v24  ;;  %v787_v28 = vmul.f32 0.03125, %v785_v4 }
 0xa20   :  { %1836 = vrsqrt.f32 %v788_v27  ;;  %v789_v29 = vadd.f32 1e-05, %v787_v28  ;;  %vm792_vm8 = vcmp.eq.f32.partialorder %v788_v27, inf  ;;  %v795_v30 = vand.u32 2147483648, %v788_v27 }
 0xa21   :  { %vm794_vm9 = vcmp.eq.f32.partialorder %v788_v27, 0.0 }
 0xa22   :  { %1838 = vrsqrt.f32 %v789_v29  ;;  %vm799_vm10 = vcmp.eq.f32.partialorder %v789_v29, inf  ;;  %v802_v36 = vand.u32 2147483648, %v789_v29  ;;  %vm801_vm11 = vcmp.eq.f32.partialorder %v789_v29, 0.0 }
 0xa2a   :  { %v1837_v26 = vpop.eup %1836 }
 0xa2b   :  { %v791_v25 = vmul.f32 %v1837_v26, %v788_v27 }
 0xa2c   :  { %v1839_v31 = vpop.eup %1838 }
 0xa2d   :  { %v793_v32 = vsel %vm792_vm8, %v788_v27, %v791_v25  ;;  %v798_v34 = vmul.f32 %v1839_v31, %v789_v29 }
 0xa2e   :  { %v796_v33 = vsel %vm794_vm9, %v795_v30, %v793_v32 }
 0xa2f   :  { %1840 = vrcp.f32 %v796_v33  ;;  %v800_v22 = vsel %vm799_vm10, %v789_v29, %v798_v34 }
 0xa30   :  { %v803_v38 = vsel %vm801_vm11, %v802_v36, %v800_v22 }
 0xa31   :  { %1842 = vrcp.f32 %v803_v38 }
 0xa39   :  { %v1841_v40 = vpop.eup %1840 }
 0xa3a   :  { %v805_v43 = vmul.f32 %v1841_v40, %v776_v7 }
 0xa3b   :  { %v1843_v44 = vpop.eup %1842 }
 0xa3c   :  { %v807_v46 = vmul.f32 %v1843_v44, %v777_v19  ;;  %v812_v47 = vmul.f32 %v811_v41, %v805_v43 }
 0xa3e   :  { %v813_v8 = vmul.f32 %v811_v41, %v807_v46  ;;  %v2369_v45 = vadd.f32 %v817_v49, %v812_v47 }
 0xa40   :  { %v2371_v56 = vadd.f32 %v817_v49, %v813_v8 }
 0xa42   :  { %v820_v57 = vpack.c.bf16 %v2371_v56, %v2369_v45 }
 0xa44   :  { %1700 = vmatmul.mubr.msk.bf16.vlgmr.msra.gmra.mrb[12].mxu0 %vm142_vm1, %v820_v57 }
 0xa45   :  { %1705 = vmatprep.mubr.msk.bf16.mxu0 %vm2030_vm0, %v2029_v0 }
 0xb17   :  { %v874_v59 = vpop.f32.mrb[12].mxu0 }
 0xb18   :  { %v875_v61 = vadd.f32 %v874_v59, %v824_v58  ;;  %v1701_v62 = vpop.f32.mrb[13].mxu0 }
 0xb19   :  { %v877_v6 = vpop.f32.mrb[14].mxu0 }
 0xb1a   :  { %v878_v63 = vadd.f32 %v877_v6, %v824_v58  ;;  %v1702_v2 = vpop.f32.mrb[15].mxu0  ;;  %v881_v3 = vmul.f32 0.25, %v875_v61 }
 0xb1c   :  { %v882_v9 = vmul.f32 0.25, %v878_v63  ;;  %v2380_v10 = vpack.c.bf16 %v878_v63, %v875_v61 }
 0xb1e   :  { %v883_v12 = vpack.c.bf16 %v882_v9, %v881_v3  ;;  %v960_v13 = vmul.bf16 %v2380_v10, %v2269_v1  ;;  %v885_v14 = vmul.bf16 %v2380_v10, %v2275_v11  ;;  %v961_v62 = vmul.bf16 %v2380_v10, %v2327_v35 }
 0xb1f   :  { %v886_v6 = vmul.bf16 %v2380_v10, %v2332_v37 }
 0xb20   :  { %963 = vrot.lane.b32.xlu1 %v960_v13, %s2032_s13  ;;  %888 = vrot.lane.b32.xlu0 %v885_v14, %s2032_s13 }
 0xb92   :  { %v964_v15 = vpop.permute.xlu1 %963  ;;  %v889_v16 = vpop.permute.xlu0 %888 }
 0xb93   :  { %v966_v17 = vsel %vm142_vm1, %v964_v15, 0  ;;  %v894_v7 = vsel %vm142_vm1, %v889_v16, 0 }
 0xb94   :  { %1704 = vmatpush3.bf16.xpose.msra.mxu0 %v894_v7  ;;  %1710 = vmatpush3.bf16.xpose.msra.mxu1 %v966_v17 }
 0xb95   :  { %1715 = vmatprep.subr.bf16.mxu0 %v2029_v0  ;;  %1727 = vmatprep.subr.bf16.mxu1 %v2029_v0 }
 0xb9b   :  { %1706 = vmatmul.mubr.msk.bf16.vlgmr.msra.gmra.mrb[16].mxu0 %vm142_vm1, %v883_v12  ;;  %1712 = vmatmul.mubr.msk.bf16.vlgmr.msra.gmra.mrb[12].mxu1 %vm142_vm1, %v883_v12 }
 0xb9c   :  { %1717 = vmatprep.mubr.msk.bf16.mxu0 %vm2030_vm0, %v2029_v0  ;;  %1731 = vmatprep.mubr.msk.bf16.mxu1 %vm2030_vm0, %v2029_v0 }
 0xc6e   :  { %v930_v18 = vpop.f32.mrb[16].mxu0  ;;  %v1002_v19 = vpop.f32.mrb[12].mxu1 }
 0xc6f   :  { %v1003_v20 = vadd.f32 %v1002_v19, %v2307_v50  ;;  %v1707_v21 = vpop.f32.mrb[17].mxu0  ;;  %v1713_v51 = vpop.f32.mrb[13].mxu1  ;;  %v931_v55 = vadd.f32 %v930_v18, %v2307_v50 }
 0xc70   :  { %v933_v54 = vpop.f32.mrb[18].mxu0  ;;  %v1005_v53 = vpop.f32.mrb[14].mxu1 }
 0xc71   :  { %v1006_v23 = vadd.f32 %v1005_v53, %v2309_v52  ;;  %v1708_v24 = vpop.f32.mrb[19].mxu0  ;;  %v1714_v4 = vpop.f32.mrb[15].mxu1  ;;  %v1009_v27 = vsel %vm565_vm7, %v1003_v20, -inf  ;;  %v934_v28 = vadd.f32 %v933_v54, %v2309_v52  ;;  %v937_v26 = vsel %vm565_vm7, %v931_v55, -inf }
 0xc72   :  { %1010 = vmax.xlane.f32.xlu1 %v1009_v27 }
 0xc73   :  { %v1012_v29 = vsel %vm565_vm7, %v1006_v23, -inf  ;;  %v940_v25 = vsel %vm565_vm7, %v934_v28, -inf }
 0xc74   :  { %1013 = vmax.xlane.f32.xlu0 %v1012_v29 }
 0xc76   :  { %938 = vmax.xlane.f32.xlu1 %v937_v26 }
 0xc78   :  { %941 = vmax.xlane.f32.xlu0 %v940_v25 }
 0xcff   :  { %v1011_v30 = vpop.xlane.xlu1 %1010 }
 0xd00   :  { %v1015_v31 = vsub.f32 %v1003_v20, %v1011_v30 }
 0xd01   :  { %v1014_v32 = vpop.xlane.xlu0 %1013 }
 0xd02   :  { %v1017_v33 = vmul.f32 1.442695, %v1015_v31  ;;  %v1016_v34 = vsub.f32 %v1006_v23, %v1014_v32 }
 0xd03   :  { %v939_v36 = vpop.xlane.xlu1 %938 }
 0xd04   :  { %1844 = vpow2.f32 %v1017_v33  ;;  %v1019_v22 = vmul.f32 1.442695, %v1016_v34  ;;  %v943_v38 = vsub.f32 %v931_v55, %v939_v36 }
 0xd05   :  { %v942_v40 = vpop.xlane.xlu0 %941 }
 0xd06   :  { %1846 = vpow2.f32 %v1019_v22  ;;  %v945_v41 = vmul.f32 1.442695, %v943_v38  ;;  %v944_v43 = vsub.f32 %v934_v28, %v942_v40  ;;  %v1802_v38 = vld [vmem:[#allocation10 + $0x20] sm:$0xff]  }
 0xd07   :  { %1728 = vmatpush3.bf16.msra.mxu1 %v1802_v38 }
 0xd08   :  { %1848 = vpow2.f32 %v945_v41  ;;  %v947_v44 = vmul.f32 1.442695, %v944_v43  ;;  %1729 = vmatprep.subr.bf16.mxu1 %v2029_v0 }
 0xd0a   :  { %1850 = vpow2.f32 %v947_v44 }
 0xd0e   :  { %v1845_v46 = vpop.eup %1844 }
 0xd0f   :  { %v1021_v47 = vsel %vm565_vm7, %v1845_v46, 0.0 }
 0xd10   :  { %v1847_v49 = vpop.eup %1846  ;;  %1022 = vadd.xlane.f32.xlu1 %v1021_v47 }
 0xd11   :  { %v1024_v8 = vsel %vm565_vm7, %v1847_v49, 0.0 }
 0xd12   :  { %v1849_v57 = vpop.eup %1848  ;;  %1025 = vadd.xlane.f32.xlu0 %v1024_v8 }
 0xd13   :  { %v949_v58 = vsel %vm565_vm7, %v1849_v57, 0.0 }
 0xd14   :  { %v1851_v59 = vpop.eup %1850  ;;  %950 = vadd.xlane.f32.xlu1 %v949_v58 }
 0xd15   :  { %v952_v61 = vsel %vm565_vm7, %v1851_v59, 0.0 }
 0xd16   :  { %953 = vadd.xlane.f32.xlu0 %v952_v61 }
 0xd25   :  { %1033 = vrot.lane.b32.xlu1 %v961_v62, %s2025_s14 }
 0xd2c   :  { %1081 = vrot.lane.b32.xlu0 %v886_v6, %s2025_s14 }
 0xd9d   :  { %v1023_v63 = vpop.xlane.xlu1 %1022 }
 0xd9e   :  { %1852 = vrcp.f32 %v1023_v63 }
 0xd9f   :  { %v1026_v2 = vpop.xlane.xlu0 %1025 }
 0xda0   :  { %1854 = vrcp.f32 %v1026_v2 }
 0xda1   :  { %v951_v3 = vpop.xlane.xlu1 %950 }
 0xda3   :  { %v954_v9 = vpop.xlane.xlu0 %953 }
 0xda4   :  { %1856 = vrcp.f32 %v954_v9  ;;  %v1175_v9 = vrot.slane %v2358_v39, %v2221_v60 }
 0xda5   :  { %v1034_v12 = vpop.permute.xlu1 %1033  ;;  %1858 = vrcp.f32 %v951_v3 }
 0xda6   :  { %1716 = vmatpush3.bf16.msra.mxu0 %v1034_v12 }
 0xda7   :  { %1721 = vmatprep.subr.bf16.mxu0 %v2029_v0  ;;  %v1082_v10 = vpop.permute.xlu0 %1081 }
 0xda8   :  { %v1853_v13 = vpop.eup %1852 }
 0xda9   :  { %v1029_v15 = vmul.f32 %v1853_v13, %v1845_v46 }
 0xdaa   :  { %v1855_v14 = vpop.eup %1854 }
 0xdab   :  { %v1030_v16 = vmul.f32 %v1855_v14, %v1847_v49 }
 0xdad   :  { %v1031_v17 = vpack.c.bf16 %v1030_v16, %v1029_v15  ;;  %v1181_v16 = vrot.slane %v2365_v42, %v2221_v60 }
 0xdae   :  { %v1857_v7 = vpop.eup %1856 }
 0xdaf   :  { %1718 = vmatmul.mubr.msk.bf16.vlgmr.msra.gmra.mrb[20].mxu0 %vm565_vm7, %v1031_v17  ;;  %v1859_v18 = vpop.eup %1858  ;;  %v958_v19 = vmul.f32 %v1857_v7, %v1851_v59 }
 0xdb0   :  { %1722 = vmatpush3.bf16.msra.mxu0 %v1082_v10  ;;  %1723 = vmatprep.mubr.msk.bf16.mxu0 %vm2030_vm0, %v2029_v0  ;;  %v957_v20 = vmul.f32 %v1859_v18, %v1849_v57 }
 0xdb1   :  { %1741 = vmatprep.subr.bf16.mxu0 %v2029_v0 }
 0xdb2   :  { %v959_v21 = vpack.c.bf16 %v958_v19, %v957_v20  ;;  %v2446_v19 = vsub.s32 2, %v2188_v5 }
 0xdb4   :  { %v1188_v20 = vrot.slane %v2265_v48, %v2446_v19 }
 0xdbb   :  { %1724 = vmatmul.mubr.msk.bf16.vlgmr.msra.gmra.mrb[20].mxu0 %vm565_vm7, %v959_v21 }
 0xdbc   :  { %1743 = vmatprep.mubr.msk.bf16.mxu0 %vm2030_vm0, %v2029_v0 }
 0xe8e   :  { %v1121_v51 = vpop.f32.mrb[20].mxu0 }
 0xe8f   :  { %v1128_v54 = vmax.f32 %v1121_v51, 0.0  ;;  %v1725_v53 = vpop.f32.mrb[21].mxu0 }
 0xe90   :  { %v1124_v55 = vpop.f32.mrb[22].mxu0 }
 0xe91   :  { %v1129_v23 = vmax.f32 %v1124_v55, 0.0  ;;  %v1726_v24 = vpop.f32.mrb[23].mxu0  ;;  %v1130_v4 = vadd.f32 %v1128_v54, %v2369_v45 }
 0xe93   :  { %v1132_v27 = vsel %vm142_vm1, %v1130_v4, 0.0  ;;  %v1131_v28 = vadd.f32 %v1129_v23, %v2371_v56  ;;  %v1803_v56 = vld [vmem:[#allocation10 + $0x28] sm:$0xff]  }
 0xe94   :  { %1133 = vadd.xlane.f32.xlu1 %v1132_v27  ;;  %1730 = vmatpush3.bf16.msra.mxu1 %v1803_v56 }
 0xe95   :  { %v1135_v29 = vsel %vm142_vm1, %v1131_v28, 0.0  ;;  %1735 = vmatprep.subr.bf16.mxu1 %v2029_v0 }
 0xe96   :  { %1136 = vadd.xlane.f32.xlu0 %v1135_v29 }
 0xf21   :  { %v1134_v26 = vpop.xlane.xlu1 %1133 }
 0xf22   :  { %v1138_v25 = vmul.f32 0.03125, %v1134_v26 }
 0xf23   :  { %v1137_v30 = vpop.xlane.xlu0 %1136 }
 0xf24   :  { %v1140_v31 = vsub.f32 %v1130_v4, %v1138_v25  ;;  %v1139_v32 = vmul.f32 0.03125, %v1137_v30 }
 0xf26   :  { %v1141_v33 = vsub.f32 %v1131_v28, %v1139_v32  ;;  %v1142_v34 = vmul.f32 %v1140_v31, %v1140_v31 }
 0xf28   :  { %v1144_v36 = vsel %vm142_vm1, %v1142_v34, 0.0  ;;  %v1143_v22 = vmul.f32 %v1141_v33, %v1141_v33 }
 0xf29   :  { %1145 = vadd.xlane.f32.xlu1 %v1144_v36 }
 0xf2a   :  { %v1147_v45 = vsel %vm142_vm1, %v1143_v22, 0.0 }
 0xf2b   :  { %1148 = vadd.xlane.f32.xlu0 %v1147_v45 }
 0xfb6   :  { %v1146_v40 = vpop.xlane.xlu1 %1145 }
 0xfb7   :  { %v1150_v41 = vmul.f32 0.03125, %v1146_v40 }
 0xfb8   :  { %v1149_v43 = vpop.xlane.xlu0 %1148 }
 0xfb9   :  { %v1152_v44 = vadd.f32 1e-05, %v1150_v41  ;;  %v1151_v46 = vmul.f32 0.03125, %v1149_v43 }
 0xfbb   :  { %1860 = vrsqrt.f32 %v1152_v44  ;;  %v1153_v47 = vadd.f32 1e-05, %v1151_v46  ;;  %vm1156_vm12 = vcmp.eq.f32.partialorder %v1152_v44, inf  ;;  %v1159_v57 = vand.u32 2147483648, %v1152_v44 }
 0xfbc   :  { %vm1158_vm13 = vcmp.eq.f32.partialorder %v1152_v44, 0.0 }
 0xfbd   :  { %1862 = vrsqrt.f32 %v1153_v47  ;;  %vm1163_vm14 = vcmp.eq.f32.partialorder %v1153_v47, inf  ;;  %v1166_v6 = vand.u32 2147483648, %v1153_v47  ;;  %vm1165_vm15 = vcmp.eq.f32.partialorder %v1153_v47, 0.0 }
 0xfc5   :  { %v1861_v49 = vpop.eup %1860 }
 0xfc6   :  { %v1155_v8 = vmul.f32 %v1861_v49, %v1152_v44 }
 0xfc7   :  { %v1863_v58 = vpop.eup %1862 }
 0xfc8   :  { %v1157_v59 = vsel %vm1156_vm12, %v1152_v44, %v1155_v8  ;;  %v1162_v62 = vmul.f32 %v1863_v58, %v1153_v47 }
 0xfc9   :  { %v1160_v61 = vsel %vm1158_vm13, %v1159_v57, %v1157_v59 }
 0xfca   :  { %1864 = vrcp.f32 %v1160_v61  ;;  %v1164_v63 = vsel %vm1163_vm14, %v1153_v47, %v1162_v62 }
 0xfcb   :  { %v1167_v2 = vsel %vm1165_vm15, %v1166_v6, %v1164_v63 }
 0xfcc   :  { %1866 = vrcp.f32 %v1167_v2 }
 0xfd4   :  { %v1865_v3 = vpop.eup %1864 }
 0xfd5   :  { %v1169_v12 = vmul.f32 %v1865_v3, %v1140_v31 }
 0xfd6   :  { %v1867_v13 = vpop.eup %1866 }
 0xfd7   :  { %v1171_v14 = vmul.f32 %v1867_v13, %v1141_v33  ;;  %v1176_v15 = vmul.f32 %v1175_v9, %v1169_v12 }
 0xfd9   :  { %v1177_v17 = vmul.f32 %v1175_v9, %v1171_v14  ;;  %v2436_v10 = vadd.f32 %v1181_v16, %v1176_v15 }
 0xfdb   :  { %v2438_v7 = vadd.f32 %v1181_v16, %v1177_v17 }
 0xfdd   :  { %v1184_v18 = vpack.c.bf16 %v2438_v7, %v2436_v10 }
 0xfdf   :  { %1732 = vmatmul.mubr.msk.bf16.vlgmr.msra.gmra.mrb[16].mxu1 %vm142_vm1, %v1184_v18 }
 0xfe0   :  { %1737 = vmatprep.mubr.msk.bf16.mxu1 %vm2030_vm0, %v2029_v0 }
0x10b2   :  { %v1238_v60 = vpop.f32.mrb[16].mxu1 }
0x10b3   :  { %v1239_v21 = vadd.f32 %v1238_v60, %v1188_v20  ;;  %v1733_v51 = vpop.f32.mrb[17].mxu1 }
0x10b4   :  { %v1241_v54 = vpop.f32.mrb[18].mxu1 }
0x10b5   :  { %v1242_v53 = vadd.f32 %v1241_v54, %v1188_v20  ;;  %v1734_v55 = vpop.f32.mrb[19].mxu1  ;;  %v1245_v23 = vmul.f32 0.25, %v1239_v21 }
0x10b7   :  { %v1246_v24 = vmul.f32 0.25, %v1242_v53  ;;  %v2450_v4 = vpack.c.bf16 %v1242_v53, %v1239_v21 }
0x10b9   :  { %v1247_v27 = vpack.c.bf16 %v1246_v24, %v1245_v23  ;;  %v1324_v28 = vmul.bf16 %v2450_v4, %v2269_v1  ;;  %v1249_v5 = vmul.bf16 %v2450_v4, %v2275_v11  ;;  %v1325_v16 = vmul.bf16 %v2450_v4, %v2327_v35 }
0x10ba   :  { %v1250_v17 = vmul.bf16 %v2450_v4, %v2332_v37 }
0x10bb   :  { %1327 = vrot.lane.b32.xlu1 %v1324_v28, %s2032_s13  ;;  %1252 = vrot.lane.b32.xlu0 %v1249_v5, %s2032_s13 }
0x112d   :  { %v1328_v48 = vpop.permute.xlu1 %1327  ;;  %v1253_v29 = vpop.permute.xlu0 %1252 }
0x112e   :  { %v1330_v26 = vsel %vm142_vm1, %v1328_v48, 0  ;;  %v1258_v25 = vsel %vm142_vm1, %v1253_v29, 0 }
0x112f   :  { %1736 = vmatpush3.bf16.xpose.msra.mxu1 %v1258_v25  ;;  %1742 = vmatpush3.bf16.xpose.msra.mxu0 %v1330_v26 }
0x1130   :  { %1747 = vmatprep.subr.bf16.mxu1 %v2029_v0 }
0x1136   :  { %1738 = vmatmul.mubr.msk.bf16.vlgmr.msra.gmra.mrb[20].mxu1 %vm142_vm1, %v1247_v27  ;;  %1744 = vmatmul.mubr.msk.bf16.vlgmr.msra.gmra.mrb[24].mxu0 %vm142_vm1, %v1247_v27 }
0x1137   :  { %1749 = vmatprep.mubr.msk.bf16.mxu1 %vm2030_vm0, %v2029_v0 }
0x1209   :  { %v1294_v1 = vpop.f32.mrb[20].mxu1  ;;  %v1366_v11 = vpop.f32.mrb[24].mxu0 }
0x120a   :  { %v1367_v30 = vadd.f32 %v1366_v11, %v2307_v50  ;;  %v1739_v31 = vpop.f32.mrb[21].mxu1  ;;  %v1745_v32 = vpop.f32.mrb[25].mxu0  ;;  %v1295_v36 = vadd.f32 %v1294_v1, %v2307_v50 }
0x120b   :  { %v1297_v33 = vpop.f32.mrb[22].mxu1  ;;  %v1369_v34 = vpop.f32.mrb[26].mxu0 }
0x120c   :  { %v1370_v22 = vadd.f32 %v1369_v34, %v2309_v52  ;;  %v1740_v45 = vpop.f32.mrb[23].mxu1  ;;  %v1746_v38 = vpop.f32.mrb[27].mxu0  ;;  %v1373_v56 = vsel %vm565_vm7, %v1367_v30, -inf  ;;  %v1298_v40 = vadd.f32 %v1297_v33, %v2309_v52  ;;  %v1301_v43 = vsel %vm565_vm7, %v1295_v36, -inf }
0x120d   :  { %1374 = vmax.xlane.f32.xlu1 %v1373_v56 }
0x120e   :  { %v1376_v41 = vsel %vm565_vm7, %v1370_v22, -inf  ;;  %v1304_v44 = vsel %vm565_vm7, %v1298_v40, -inf }
0x120f   :  { %1377 = vmax.xlane.f32.xlu0 %v1376_v41 }
0x1211   :  { %1302 = vmax.xlane.f32.xlu1 %v1301_v43 }
0x1213   :  { %1305 = vmax.xlane.f32.xlu0 %v1304_v44 }
0x129a   :  { %v1375_v46 = vpop.xlane.xlu1 %1374 }
0x129b   :  { %v1379_v50 = vsub.f32 %v1367_v30, %v1375_v46 }
0x129c   :  { %v1378_v47 = vpop.xlane.xlu0 %1377 }
0x129d   :  { %v1381_v49 = vmul.f32 1.442695, %v1379_v50  ;;  %v1380_v8 = vsub.f32 %v1370_v22, %v1378_v47 }
0x129e   :  { %v1303_v57 = vpop.xlane.xlu1 %1302 }
0x129f   :  { %1868 = vpow2.f32 %v1381_v49  ;;  %v1383_v58 = vmul.f32 1.442695, %v1380_v8  ;;  %v1307_v59 = vsub.f32 %v1295_v36, %v1303_v57 }
0x12a0   :  { %v1306_v61 = vpop.xlane.xlu0 %1305 }
0x12a1   :  { %1870 = vpow2.f32 %v1383_v58  ;;  %v1309_v52 = vmul.f32 1.442695, %v1307_v59  ;;  %v1308_v62 = vsub.f32 %v1298_v40, %v1306_v61 }
0x12a3   :  { %1872 = vpow2.f32 %v1309_v52  ;;  %v1311_v6 = vmul.f32 1.442695, %v1308_v62 }
0x12a5   :  { %1874 = vpow2.f32 %v1311_v6 }
0x12a9   :  { %v1869_v63 = vpop.eup %1868 }
0x12aa   :  { %v1385_v2 = vsel %vm565_vm7, %v1869_v63, 0.0 }
0x12ab   :  { %v1871_v3 = vpop.eup %1870  ;;  %1386 = vadd.xlane.f32.xlu1 %v1385_v2  ;;  %v1539_v2 = vrot.slane %v2358_v39, %v2446_v19 }
0x12ac   :  { %v1388_v9 = vsel %vm565_vm7, %v1871_v3, 0.0 }
0x12ad   :  { %v1873_v12 = vpop.eup %1872  ;;  %1389 = vadd.xlane.f32.xlu0 %v1388_v9  ;;  %v1545_v9 = vrot.slane %v2365_v42, %v2446_v19 }
0x12ae   :  { %v1313_v13 = vsel %vm565_vm7, %v1873_v12, 0.0 }
0x12af   :  { %v1875_v14 = vpop.eup %1874  ;;  %1314 = vadd.xlane.f32.xlu1 %v1313_v13 }
0x12b0   :  { %v1316_v15 = vsel %vm565_vm7, %v1875_v14, 0.0 }
0x12b1   :  { %1317 = vadd.xlane.f32.xlu0 %v1316_v15 }
0x12c0   :  { %1397 = vrot.lane.b32.xlu1 %v1325_v16, %s2025_s14 }
0x12c7   :  { %1445 = vrot.lane.b32.xlu0 %v1250_v17, %s2025_s14  ;;  %s1990_s14 = scalar_lea.vmem %s1556_s9, 256 }
0x12c8   :  { %p1991_p7 = scmp.ne.s32.totalorder %s1556_s9, %s1990_s14  ;;  %p1996_p9 = scmp.lt.s32.totalorder %s1990_s14, %s1990_s14 }
0x12ca   :  { %p1997_p10 = por %p1996_p9, %p1995_p8 }
0x12cc   :  { %p1998_p11 = pnand %p1997_p10, %p1991_p7 }
0x1338   :  { %v1387_v18 = vpop.xlane.xlu1 %1386 }
0x1339   :  { %1876 = vrcp.f32 %v1387_v18 }
0x133a   :  { %v1390_v20 = vpop.xlane.xlu0 %1389 }
0x133b   :  { %1878 = vrcp.f32 %v1390_v20 }
0x133c   :  { %v1315_v60 = vpop.xlane.xlu1 %1314 }
0x133e   :  { %v1318_v21 = vpop.xlane.xlu0 %1317 }
0x133f   :  { %1880 = vrcp.f32 %v1318_v21 }
0x1340   :  { %v1398_v51 = vpop.permute.xlu1 %1397  ;;  %1882 = vrcp.f32 %v1315_v60 }
0x1341   :  { %1748 = vmatpush3.bf16.msra.mxu1 %v1398_v51 }
0x1342   :  { %1753 = vmatprep.subr.bf16.mxu1 %v2029_v0  ;;  %v1446_v37 = vpop.permute.xlu0 %1445 }
0x1343   :  { %v1877_v54 = vpop.eup %1876 }
0x1344   :  { %v1393_v53 = vmul.f32 %v1877_v54, %v1869_v63 }
0x1345   :  { %v1879_v35 = vpop.eup %1878 }
0x1346   :  { %v1394_v55 = vmul.f32 %v1879_v35, %v1871_v3 }
0x1348   :  { %v1395_v23 = vpack.c.bf16 %v1394_v55, %v1393_v53 }
0x1349   :  { %v1881_v24 = vpop.eup %1880 }
0x134a   :  { %1750 = vmatmul.mubr.msk.bf16.vlgmr.msra.gmra.mrb[24].mxu1 %vm565_vm7, %v1395_v23  ;;  %v1883_v4 = vpop.eup %1882  ;;  %v1322_v27 = vmul.f32 %v1881_v24, %v1875_v14 }
0x134b   :  { %1754 = vmatpush3.bf16.msra.mxu1 %v1446_v37  ;;  %1755 = vmatprep.mubr.msk.bf16.mxu1 %vm2030_vm0, %v2029_v0  ;;  %v1321_v28 = vmul.f32 %v1883_v4, %v1873_v12 }
0x134d   :  { %v1323_v5 = vpack.c.bf16 %v1322_v27, %v1321_v28 }
0x1356   :  { %1756 = vmatmul.mubr.msk.bf16.vlgmr.msra.gmra.mrb[24].mxu1 %vm565_vm7, %v1323_v5 }
0x1429   :  { %v1485_v48 = vpop.f32.mrb[24].mxu1 }
0x142a   :  { %v1492_v29 = vmax.f32 %v1485_v48, 0.0  ;;  %v1757_v26 = vpop.f32.mrb[25].mxu1 }
0x142b   :  { %v1488_v25 = vpop.f32.mrb[26].mxu1 }
0x142c   :  { %v1493_v1 = vmax.f32 %v1488_v25, 0.0  ;;  %v1758_v11 = vpop.f32.mrb[27].mxu1  ;;  %v1494_v30 = vadd.f32 %v1492_v29, %v2436_v10 }
0x142e   :  { %v1496_v31 = vsel %vm142_vm1, %v1494_v30, 0.0  ;;  %v1495_v32 = vadd.f32 %v1493_v1, %v2438_v7 }
0x142f   :  { %1497 = vadd.xlane.f32.xlu1 %v1496_v31 }
0x1430   :  { %v1499_v0 = vsel %vm142_vm1, %v1495_v32, 0.0 }
0x1431   :  { %1500 = vadd.xlane.f32.xlu0 %v1499_v0 }
0x14bc   :  { %v1498_v33 = vpop.xlane.xlu1 %1497 }
0x14bd   :  { %v1502_v34 = vmul.f32 0.03125, %v1498_v33 }
0x14be   :  { %v1501_v36 = vpop.xlane.xlu0 %1500 }
0x14bf   :  { %v1504_v22 = vsub.f32 %v1494_v30, %v1502_v34  ;;  %v1503_v45 = vmul.f32 0.03125, %v1501_v36 }
0x14c1   :  { %v1505_v38 = vsub.f32 %v1495_v32, %v1503_v45  ;;  %v1506_v56 = vmul.f32 %v1504_v22, %v1504_v22 }
0x14c3   :  { %v1508_v40 = vsel %vm142_vm1, %v1506_v56, 0.0  ;;  %v1507_v41 = vmul.f32 %v1505_v38, %v1505_v38 }
0x14c4   :  { %1509 = vadd.xlane.f32.xlu1 %v1508_v40 }
0x14c5   :  { %v1511_v10 = vsel %vm142_vm1, %v1507_v41, 0.0 }
0x14c6   :  { %1512 = vadd.xlane.f32.xlu0 %v1511_v10 }
0x1551   :  { %v1510_v43 = vpop.xlane.xlu1 %1509 }
0x1552   :  { %v1514_v7 = vmul.f32 0.03125, %v1510_v43 }
0x1553   :  { %v1513_v44 = vpop.xlane.xlu0 %1512 }
0x1554   :  { %v1516_v46 = vadd.f32 1e-05, %v1514_v7  ;;  %v1515_v50 = vmul.f32 0.03125, %v1513_v44 }
0x1556   :  { %1884 = vrsqrt.f32 %v1516_v46  ;;  %v1517_v47 = vadd.f32 1e-05, %v1515_v50  ;;  %vm1520_vm0 = vcmp.eq.f32.partialorder %v1516_v46, inf  ;;  %v1523_v57 = vand.u32 2147483648, %v1516_v46 }
0x1557   :  { %vm1522_vm2 = vcmp.eq.f32.partialorder %v1516_v46, 0.0 }
0x1558   :  { %1886 = vrsqrt.f32 %v1517_v47  ;;  %vm1527_vm3 = vcmp.eq.f32.partialorder %v1517_v47, inf  ;;  %v1530_v62 = vand.u32 2147483648, %v1517_v47  ;;  %vm1529_vm4 = vcmp.eq.f32.partialorder %v1517_v47, 0.0 }
0x1560   :  { %v1885_v49 = vpop.eup %1884 }
0x1561   :  { %v1519_v8 = vmul.f32 %v1885_v49, %v1516_v46 }
0x1562   :  { %v1887_v58 = vpop.eup %1886 }
0x1563   :  { %v1521_v59 = vsel %vm1520_vm0, %v1516_v46, %v1519_v8  ;;  %v1526_v52 = vmul.f32 %v1887_v58, %v1517_v47 }
0x1564   :  { %v1524_v61 = vsel %vm1522_vm2, %v1523_v57, %v1521_v59 }
0x1565   :  { %1888 = vrcp.f32 %v1524_v61  ;;  %v1528_v6 = vsel %vm1527_vm3, %v1517_v47, %v1526_v52 }
0x1566   :  { %v1531_v63 = vsel %vm1529_vm4, %v1530_v62, %v1528_v6 }
0x1567   :  { %1890 = vrcp.f32 %v1531_v63 }
0x156f   :  { %v1889_v3 = vpop.eup %1888 }
0x1570   :  { %v1533_v12 = vmul.f32 %v1889_v3, %v1504_v22 }
0x1571   :  { %v1891_v13 = vpop.eup %1890 }
0x1572   :  { %v1540_v14 = vmul.f32 %v1539_v2, %v1533_v12  ;;  %v1535_v15 = vmul.f32 %v1891_v13, %v1505_v38 }
0x1574   :  { %v1546_v16 = vadd.f32 %v1545_v9, %v1540_v14  ;;  %v1541_v17 = vmul.f32 %v1539_v2, %v1535_v15 }
0x1576   :  { %1548 = vst.msk [vmem:[#allocation12] sm:$0xff] %vm142_vm1, %v1546_v16  ;;  %v1547_v18 = vadd.f32 %v1545_v9, %v1541_v17 }
0x1578   :  { %1549 = vst.msk [vmem:[#allocation12 + $0x8] sm:$0xff] %vm142_vm1, %v1547_v18 }
0x1579   :  { %2001 = shalt.err (!%p1998_p11)
}
0x157a   :  { %s2002_s21 = scalar_lea.hbm %s2523_s10, 256 }
0x157b   :  { %p2003_p12 = scmp.ne.s32.totalorder %s2523_s10, %s2002_s21  ;;  %p2006_p13 = scmp.lt.u32.totalorder %s2002_s21, %s2523_s10 }
0x157d   :  { %p2008_p0 = pnand %p2006_p13, %p2003_p12 }
0x157f   :  { %2011 = shalt.err (!%p2008_p0)
}
0x1580   :  { %s2037_s2 = smov 128  }
0x1581   :  { %1561 = dma.vmem_to_hbm [thread:$0]  %s1556_s9, 256, %s2523_s10, [#allocation6], %s2037_s2, %s2037_s2, %s2034_s16  }
0x1582   :  { %2020 = dma.done.wait [#allocation6], 256  }
0x1583   :  { %2021 = vsyncadd [#allocation6], 4294967040 }
0x1584   :  { %1565 = vsyncpa [#allocation5], 1 }
0x1585   :  { %1566 = vsyncpa [#allocation8], 1 }
0x1586   :  { %1567 = vsyncpa [#allocation11], 1 }
0x1587   :  { %1568 = vsyncpa [#allocation6], 1 }

</bundles_post_ra>
